<compile_context>
chip_gen: v7x
topology: tpu7x:2x2x1
jax: 0.10.0
libtpu: 0.0.40
codegen_flags: <defaults>
</compile_context>

<pallas_src>
import functools

import jax
import jax.numpy as jnp
from jax.experimental import pallas as pl
from jax.experimental.pallas import tpu as pltpu

IN_F = 784     # input features
H1 = 400       # layer-1 out features (logical)
H1P = 512      # layer-1 out features padded to a lane-dense multiple of 128
H2 = 128       # layer-2 out features
OUT_F = 10     # classifier out features


def _rps_mlp_kernel(sched_ref, x_ref, w1_ref, w2_ref, b1_ref, b2_ref,
                    w3_ref, b3_ref, o_ref, acc1_ref, acc2_ref, *, n1, n_steps):
    """One grid step = one active module of layer 1 (steps < n1) or layer 2.

    sched_ref : SMEM (2, n_steps) int32  w1/w2 block index per step (index_map only)
    x_ref     : VMEM (B, 784)   f32
    w1_ref    : VMEM (784, 512) bf16     active layer-1 module for this step
    w2_ref    : VMEM (512, 128) bf16     active layer-2 module for this step
    b1_ref    : VMEM (1, 512)   f32      sum of active layer-1 biases
    b2_ref    : VMEM (1, 128)   f32      sum of active layer-2 biases
    w3_ref    : VMEM (128, 10)  f32
    b3_ref    : VMEM (1, 10)    f32
    o_ref     : VMEM (B, 10)    f32
    acc1_ref  : VMEM (B, 512)   f32 scratch (layer-1 accumulator)
    acc2_ref  : VMEM (B, 128)   f32 scratch (layer-2 accumulator)
    """
    s = pl.program_id(0)

    @pl.when(s == 0)
    def _init():
        acc1_ref[...] = jnp.zeros_like(acc1_ref)
        acc2_ref[...] = jnp.zeros_like(acc2_ref)

    @pl.when(s < n1)
    def _layer1():
        x = x_ref[...].astype(jnp.bfloat16)
        acc1_ref[...] += jnp.dot(x, w1_ref[...],
                                 preferred_element_type=jnp.float32)

    @pl.when(s >= n1)
    def _layer2():
        h1 = jnp.maximum(acc1_ref[...] + b1_ref[...], 0.0)
        acc2_ref[...] += jnp.dot(h1.astype(jnp.bfloat16), w2_ref[...],
                                 preferred_element_type=jnp.float32)

    @pl.when(s == n_steps - 1)
    def _finalize():
        h2 = jnp.maximum(acc2_ref[...] + b2_ref[...], 0.0)
        out = jnp.dot(h2, w3_ref[...],
                      preferred_element_type=jnp.float32) + b3_ref[...]
        o_ref[...] = out.astype(o_ref.dtype)


def prepare_params(raw):
    """One-time conversion of PyTorch-layout (out, in) f32 params to kernel layout."""
    w1 = jnp.transpose(raw["w1"], (0, 2, 1))                              # (M, 784, 400)
    w1 = jnp.pad(w1, ((0, 0), (0, 0), (0, H1P - H1))).astype(jnp.bfloat16)
    b1 = jnp.pad(raw["b1"], ((0, 0), (0, H1P - H1))).astype(jnp.float32)  # (M, 512)
    w2 = jnp.transpose(raw["w2"], (0, 2, 1))                              # (M, 400, 128)
    w2 = jnp.pad(w2, ((0, 0), (0, H1P - H1), (0, 0))).astype(jnp.bfloat16)
    b2 = raw["b2"].astype(jnp.float32)                                    # (M, 128)
    w3 = jnp.transpose(raw["w3"], (0, 2, 1)).astype(jnp.float32)          # (L, 128, 10)
    b3 = raw["b3"].astype(jnp.float32)                                    # (L, 10)
    return {"w1": w1, "b1": b1, "w2": w2, "b2": b2, "w3": w3, "b3": b3}


def rps_net_mlp_forward(x, params, path, last):
    """JAX/Pallas equivalent of RPS_net_mlp.forward(x, path, last).

    `params` must come from prepare_params().  `path` is a host-side nested
    list; module 0 of each layer is always used and module j>0 only if
    path[l][j] == 1 (exact equality, matching the PyTorch code).
    """
    M = params["w1"].shape[0]
    B = x.shape[0]

    act1 = [0] + [j for j in range(1, M) if path[0][j] == 1]
    act2 = [0] + [j for j in range(1, M) if path[1][j] == 1]
    n1, n2 = len(act1), len(act2)
    n_steps = n1 + n2

    # Per-step w1/w2 block indices; repeating an index => no new DMA that step.
    w1_sched = act1 + [act1[-1]] * n2
    w2_sched = [act2[0]] * n1 + act2
    sched = jnp.asarray([w1_sched, w2_sched], dtype=jnp.int32)

    # Biases summed over the active set once; added at each layer finalize.
    b1_sum = params["b1"][jnp.asarray(act1)].sum(axis=0, keepdims=True)   # (1, 512)
    b2_sum = params["b2"][jnp.asarray(act2)].sum(axis=0, keepdims=True)   # (1, 128)
    w3 = params["w3"][last]                                               # (128, 10)
    b3 = params["b3"][last][None, :]                                      # (1, 10)

    kernel = functools.partial(_rps_mlp_kernel, n1=n1, n_steps=n_steps)

    grid_spec = pltpu.PrefetchScalarGridSpec(
        num_scalar_prefetch=1,
        grid=(n_steps,),
        in_specs=[
            pl.BlockSpec((B, IN_F), lambda s, sch: (0, 0)),
            pl.BlockSpec((None, IN_F, H1P), lambda s, sch: (sch[0, s], 0, 0)),
            pl.BlockSpec((None, H1P, H2), lambda s, sch: (sch[1, s], 0, 0)),
            pl.BlockSpec((1, H1P), lambda s, sch: (0, 0)),
            pl.BlockSpec((1, H2), lambda s, sch: (0, 0)),
            pl.BlockSpec((H2, OUT_F), lambda s, sch: (0, 0)),
            pl.BlockSpec((1, OUT_F), lambda s, sch: (0, 0)),
        ],
        out_specs=pl.BlockSpec((B, OUT_F), lambda s, sch: (0, 0)),
        scratch_shapes=[pltpu.VMEM((B, H1P), jnp.float32),
                        pltpu.VMEM((B, H2), jnp.float32)],
    )

    return pl.pallas_call(
        kernel,
        out_shape=jax.ShapeDtypeStruct((B, OUT_F), jnp.float32),
        grid_spec=grid_spec,
        compiler_params=pltpu.CompilerParams(
            dimension_semantics=("arbitrary",)),
    )(sched, x, params["w1"], params["w2"], b1_sum, b2_sum, w3, b3)


def _init_params(key, M):
    """Synthetic nn.Linear-style init in PyTorch layout: weight (out, in)."""
    ks = jax.random.split(key, 6)

    def unif(k, shape, fan_in):
        bound = 1.0 / jnp.sqrt(fan_in)
        return jax.random.uniform(k, shape, jnp.float32, -bound, bound)

    return {
        "w1": unif(ks[0], (M, H1, IN_F), float(IN_F)),
        "b1": unif(ks[1], (M, H1), float(IN_F)),
        "w2": unif(ks[2], (M, H2, H1), float(H1)),
        "b2": unif(ks[3], (M, H2), float(H1)),
        "w3": unif(ks[4], (1, OUT_F, H2), float(H2)),   # final_layers (len 1)
        "b3": unif(ks[5], (1, OUT_F), float(H2)),
    }


def _reference_forward_f32(x, raw, path, last):
    """Pure-JAX float32 reference mirroring the PyTorch forward literally."""
    M = raw["w1"].shape[0]
    y = x @ raw["w1"][0].T + raw["b1"][0]
    for j in range(1, M):
        if path[0][j] == 1:
            y = y + x @ raw["w1"][j].T + raw["b1"][j]
    h = jnp.maximum(y, 0.0)
    y = h @ raw["w2"][0].T + raw["b2"][0]
    for j in range(1, M):
        if path[1][j] == 1:
            y = y + h @ raw["w2"][j].T + raw["b2"][j]
    h = jnp.maximum(y, 0.0)
    return h @ raw["w3"][last].T + raw["b3"][last]


def _reference_forward_prepared(x, prep, path, last):
    """Reference using the same bf16 weights / f32 accumulation as the kernel."""
    M = prep["w1"].shape[0]
    act1 = [0] + [j for j in range(1, M) if path[0][j] == 1]
    act2 = [0] + [j for j in range(1, M) if path[1][j] == 1]
    xb = x.astype(jnp.bfloat16)
    acc1 = sum(jnp.dot(xb, prep["w1"][j], preferred_element_type=jnp.float32)
               for j in act1)
    acc1 = acc1 + prep["b1"][jnp.asarray(act1)].sum(axis=0)
    h1 = jnp.maximum(acc1, 0.0)
    acc2 = sum(jnp.dot(h1.astype(jnp.bfloat16), prep["w2"][j],
                       preferred_element_type=jnp.float32) for j in act2)
    acc2 = acc2 + prep["b2"][jnp.asarray(act2)].sum(axis=0)
    h2 = jnp.maximum(acc2, 0.0)
    return jnp.dot(h2, prep["w3"][last],
                   preferred_element_type=jnp.float32) + prep["b3"][last]


if __name__ == "__main__":
    B, M = 2, 2
    key = jax.random.PRNGKey(0)
    kx, kp = jax.random.split(key)

    x = jax.random.normal(kx, (B, IN_F), jnp.float32)
    raw = _init_params(kp, M)          # PyTorch-layout float32 params
    params = prepare_params(raw)       # one-time: transpose / pad / bf16

    path = [[1, 1], [1, 0]]            # layer-1 active: {0,1}; layer-2 active: {0}
    last = 0

    out = jax.block_until_ready(rps_net_mlp_forward(x, params, path, last))
    assert out.shape == (B, OUT_F)

    # Exact-math check (same bf16 weights / f32 accumulation as the kernel).
    ref_same = _reference_forward_prepared(x, params, path, last)
    assert jnp.allclose(out, ref_same, atol=1e-3, rtol=1e-3), \
        "kernel vs matched-precision reference mismatch"

    # Semantics check vs the full-f32 PyTorch-equivalent forward (bf16 drift expected).
    ref_f32 = _reference_forward_f32(x, raw, path, last)
    assert jnp.allclose(out, ref_f32, atol=5e-2, rtol=5e-2), \
        "kernel vs float32 reference mismatch"

    print("KERNEL_OK")
</pallas_src>

<mosaic_0001>
module attributes {stable_mosaic.version = 11 : i64} {
  func.func @_rps_mlp_kernel(%arg0: i32, %arg1: memref<2x3xi32, #tpu.memory_space<smem>>, %arg2: memref<2x784xf32, #tpu.memory_space<vmem>>, %arg3: memref<1x784x512xbf16, #tpu.memory_space<vmem>>, %arg4: memref<1x512x128xbf16, #tpu.memory_space<vmem>>, %arg5: memref<1x512xf32, #tpu.memory_space<vmem>>, %arg6: memref<1x128xf32, #tpu.memory_space<vmem>>, %arg7: memref<128x10xf32, #tpu.memory_space<vmem>>, %arg8: memref<1x10xf32, #tpu.memory_space<vmem>>, %arg9: memref<2x10xf32, #tpu.memory_space<vmem>>, %arg10: memref<2x512xf32, #tpu.memory_space<vmem>>, %arg11: memref<2x128xf32, #tpu.memory_space<vmem>>) attributes {dimension_semantics = [#tpu.dimension_semantics<arbitrary>], iteration_bounds = array<i64: 3>, scalar_prefetch = 1 : i64, scratch_operands = 2 : i64, tpu.core_type = #tpu.core_type<tc>, window_params = [{pipeline_mode = #tpu.pipeline_mode<synchronous>, transform_indices = @transform_0, window_bounds = array<i64: 2, 784>}, {transform_indices = @transform_1, window_bounds = array<i64: 1, 784, 512>}, {transform_indices = @transform_2, window_bounds = array<i64: 1, 512, 128>}, {pipeline_mode = #tpu.pipeline_mode<synchronous>, transform_indices = @transform_3, window_bounds = array<i64: 1, 512>}, {pipeline_mode = #tpu.pipeline_mode<synchronous>, transform_indices = @transform_4, window_bounds = array<i64: 1, 128>}, {pipeline_mode = #tpu.pipeline_mode<synchronous>, transform_indices = @transform_5, window_bounds = array<i64: 128, 10>}, {pipeline_mode = #tpu.pipeline_mode<synchronous>, transform_indices = @transform_6, window_bounds = array<i64: 1, 10>}, {pipeline_mode = #tpu.pipeline_mode<synchronous>, transform_indices = @transform_7, window_bounds = array<i64: 2, 10>}]} {
    %c0_i32 = arith.constant 0 : i32
    %0 = arith.cmpi eq, %arg0, %c0_i32 : i32
    %1 = arith.extui %0 : i1 to i32
    %c0_i32_0 = arith.constant 0 : i32
    %2 = arith.cmpi ne, %1, %c0_i32_0 : i32
    scf.if %2 {
      %cst = arith.constant 0.000000e+00 : f32
      %12 = vector.broadcast %cst : f32 to vector<2x512xf32>
      %c0 = arith.constant 0 : index
      %c0_6 = arith.constant 0 : index
      %13 = vector.load %arg10[%c0, %c0_6] : memref<2x512xf32, #tpu.memory_space<vmem>>, vector<2x512xf32>
      tpu.vector_store %arg10[%c0, %c0_6], %12 {strides = array<i32>} : memref<2x512xf32, #tpu.memory_space<vmem>>, vector<2x512xf32>,
      %cst_7 = arith.constant 0.000000e+00 : f32
      %14 = vector.broadcast %cst_7 : f32 to vector<2x128xf32>
      %c0_8 = arith.constant 0 : index
      %c0_9 = arith.constant 0 : index
      %15 = vector.load %arg11[%c0_8, %c0_9] : memref<2x128xf32, #tpu.memory_space<vmem>>, vector<2x128xf32>
      tpu.vector_store %arg11[%c0_8, %c0_9], %14 {strides = array<i32>} : memref<2x128xf32, #tpu.memory_space<vmem>>, vector<2x128xf32>,
    } else {
    }
    %c2_i32 = arith.constant 2 : i32
    %3 = arith.cmpi slt, %arg0, %c2_i32 : i32
    %4 = arith.extui %3 : i1 to i32
    %c0_i32_1 = arith.constant 0 : i32
    %5 = arith.cmpi ne, %4, %c0_i32_1 : i32
    scf.if %5 {
      %c0 = arith.constant 0 : index
      %c0_6 = arith.constant 0 : index
      %12 = vector.load %arg2[%c0, %c0_6] : memref<2x784xf32, #tpu.memory_space<vmem>>, vector<2x784xf32>
      %13 = arith.truncf %12 : vector<2x784xf32> to vector<2x784xbf16>
      %c0_7 = arith.constant 0 : index
      %c0_8 = arith.constant 0 : index
      %14 = vector.load %arg10[%c0_7, %c0_8] : memref<2x512xf32, #tpu.memory_space<vmem>>, vector<2x512xf32>
      %c0_9 = arith.constant 0 : index
      %c0_10 = arith.constant 0 : index
      %c0_11 = arith.constant 0 : index
      %15 = vector.load %arg3[%c0_9, %c0_10, %c0_11] : memref<1x784x512xbf16, #tpu.memory_space<vmem>>, vector<1x784x512xbf16>
      %16 = vector.shape_cast %15 : vector<1x784x512xbf16> to vector<784x512xbf16>
      %cst = arith.constant dense<0.000000e+00> : vector<2x512xf32>
      %17 = tpu.matmul %13, %16, %cst {dimension_numbers = #tpu.dot_dimension_numbers<[1], [0], [0], [1], [0, 0, 1, 1], [], []>} : vector<2x784xbf16>, vector<784x512xbf16>, vector<2x512xf32> -> vector<2x512xf32>
      %18 = arith.addf %14, %17 : vector<2x512xf32>
      %c0_12 = arith.constant 0 : index
      %c0_13 = arith.constant 0 : index
      %19 = vector.load %arg10[%c0_12, %c0_13] : memref<2x512xf32, #tpu.memory_space<vmem>>, vector<2x512xf32>
      tpu.vector_store %arg10[%c0_12, %c0_13], %18 {strides = array<i32>} : memref<2x512xf32, #tpu.memory_space<vmem>>, vector<2x512xf32>,
    } else {
    }
    %c2_i32_2 = arith.constant 2 : i32
    %6 = arith.cmpi sge, %arg0, %c2_i32_2 : i32
    %7 = arith.extui %6 : i1 to i32
    %c0_i32_3 = arith.constant 0 : i32
    %8 = arith.cmpi ne, %7, %c0_i32_3 : i32
    scf.if %8 {
      %c0 = arith.constant 0 : index
      %c0_6 = arith.constant 0 : index
      %12 = vector.load %arg10[%c0, %c0_6] : memref<2x512xf32, #tpu.memory_space<vmem>>, vector<2x512xf32>
      %c0_7 = arith.constant 0 : index
      %c0_8 = arith.constant 0 : index
      %13 = vector.load %arg5[%c0_7, %c0_8] : memref<1x512xf32, #tpu.memory_space<vmem>>, vector<1x512xf32>
      %14 = vector.broadcast %13 : vector<1x512xf32> to vector<2x512xf32>
      %15 = arith.addf %12, %14 : vector<2x512xf32>
      %cst = arith.constant 0.000000e+00 : f32
      %16 = vector.broadcast %cst : f32 to vector<2x512xf32>
      %17 = arith.maximumf %15, %16 : vector<2x512xf32>
      %c0_9 = arith.constant 0 : index
      %c0_10 = arith.constant 0 : index
      %18 = vector.load %arg11[%c0_9, %c0_10] : memref<2x128xf32, #tpu.memory_space<vmem>>, vector<2x128xf32>
      %19 = arith.truncf %17 : vector<2x512xf32> to vector<2x512xbf16>
      %c0_11 = arith.constant 0 : index
      %c0_12 = arith.constant 0 : index
      %c0_13 = arith.constant 0 : index
      %20 = vector.load %arg4[%c0_11, %c0_12, %c0_13] : memref<1x512x128xbf16, #tpu.memory_space<vmem>>, vector<1x512x128xbf16>
      %21 = vector.shape_cast %20 : vector<1x512x128xbf16> to vector<512x128xbf16>
      %cst_14 = arith.constant dense<0.000000e+00> : vector<2x128xf32>
      %22 = tpu.matmul %19, %21, %cst_14 {dimension_numbers = #tpu.dot_dimension_numbers<[1], [0], [0], [1], [0, 0, 1, 1], [], []>} : vector<2x512xbf16>, vector<512x128xbf16>, vector<2x128xf32> -> vector<2x128xf32>
      %23 = arith.addf %18, %22 : vector<2x128xf32>
      %c0_15 = arith.constant 0 : index
      %c0_16 = arith.constant 0 : index
      %24 = vector.load %arg11[%c0_15, %c0_16] : memref<2x128xf32, #tpu.memory_space<vmem>>, vector<2x128xf32>
      tpu.vector_store %arg11[%c0_15, %c0_16], %23 {strides = array<i32>} : memref<2x128xf32, #tpu.memory_space<vmem>>, vector<2x128xf32>,
    } else {
    }
    %c2_i32_4 = arith.constant 2 : i32
    %9 = arith.cmpi eq, %arg0, %c2_i32_4 : i32
    %10 = arith.extui %9 : i1 to i32
    %c0_i32_5 = arith.constant 0 : i32
    %11 = arith.cmpi ne, %10, %c0_i32_5 : i32
    scf.if %11 {
      %c0 = arith.constant 0 : index
      %c0_6 = arith.constant 0 : index
      %12 = vector.load %arg11[%c0, %c0_6] : memref<2x128xf32, #tpu.memory_space<vmem>>, vector<2x128xf32>
      %c0_7 = arith.constant 0 : index
      %c0_8 = arith.constant 0 : index
      %13 = vector.load %arg6[%c0_7, %c0_8] : memref<1x128xf32, #tpu.memory_space<vmem>>, vector<1x128xf32>
      %14 = vector.broadcast %13 : vector<1x128xf32> to vector<2x128xf32>
      %15 = arith.addf %12, %14 : vector<2x128xf32>
      %cst = arith.constant 0.000000e+00 : f32
      %16 = vector.broadcast %cst : f32 to vector<2x128xf32>
      %17 = arith.maximumf %15, %16 : vector<2x128xf32>
      %c0_9 = arith.constant 0 : index
      %c0_10 = arith.constant 0 : index
      %18 = vector.load %arg7[%c0_9, %c0_10] : memref<128x10xf32, #tpu.memory_space<vmem>>, vector<128x10xf32>
      %cst_11 = arith.constant dense<0.000000e+00> : vector<2x10xf32>
      %19 = tpu.matmul %17, %18, %cst_11 {dimension_numbers = #tpu.dot_dimension_numbers<[1], [0], [0], [1], [0, 0, 1, 1], [], []>} : vector<2x128xf32>, vector<128x10xf32>, vector<2x10xf32> -> vector<2x10xf32>
      %c0_12 = arith.constant 0 : index
      %c0_13 = arith.constant 0 : index
      %20 = vector.load %arg8[%c0_12, %c0_13] : memref<1x10xf32, #tpu.memory_space<vmem>>, vector<1x10xf32>
      %21 = vector.broadcast %20 : vector<1x10xf32> to vector<2x10xf32>
      %22 = arith.addf %19, %21 : vector<2x10xf32>
      %c0_14 = arith.constant 0 : index
      %c0_15 = arith.constant 0 : index
      %23 = vector.load %arg9[%c0_14, %c0_15] : memref<2x10xf32, #tpu.memory_space<vmem>>, vector<2x10xf32>
      tpu.vector_store %arg9[%c0_14, %c0_15], %22 {strides = array<i32>} : memref<2x10xf32, #tpu.memory_space<vmem>>, vector<2x10xf32>,
    } else {
    }
    return
  }
  func.func @transform_0(%arg0: i32, %arg1: memref<2x3xi32, #tpu.memory_space<smem>>) -> (i32, i32) {
    %c0_i32 = arith.constant 0 : i32
    %c0_i32_0 = arith.constant 0 : i32
    %c0_i32_1 = arith.constant 0 : i32
    return %c0_i32, %c0_i32_0 : i32, i32
  }
  func.func @transform_1(%arg0: i32, %arg1: memref<2x3xi32, #tpu.memory_space<smem>>) -> (i32, i32, i32) {
    %c0 = arith.constant 0 : index
    %0 = arith.index_cast %arg0 : i32 to index
    %1 = memref.load %arg1[%c0, %0] : memref<2x3xi32, #tpu.memory_space<smem>>
    %c0_i32 = arith.constant 0 : i32
    %c0_i32_0 = arith.constant 0 : i32
    %c0_i32_1 = arith.constant 0 : i32
    return %1, %c0_i32, %c0_i32_0 : i32, i32, i32
  }
  func.func @transform_2(%arg0: i32, %arg1: memref<2x3xi32, #tpu.memory_space<smem>>) -> (i32, i32, i32) {
    %c1 = arith.constant 1 : index
    %0 = arith.index_cast %arg0 : i32 to index
    %1 = memref.load %arg1[%c1, %0] : memref<2x3xi32, #tpu.memory_space<smem>>
    %c0_i32 = arith.constant 0 : i32
    %c0_i32_0 = arith.constant 0 : i32
    %c0_i32_1 = arith.constant 0 : i32
    return %1, %c0_i32, %c0_i32_0 : i32, i32, i32
  }
  func.func @transform_3(%arg0: i32, %arg1: memref<2x3xi32, #tpu.memory_space<smem>>) -> (i32, i32) {
    %c0_i32 = arith.constant 0 : i32
    %c0_i32_0 = arith.constant 0 : i32
    %c0_i32_1 = arith.constant 0 : i32
    return %c0_i32, %c0_i32_0 : i32, i32
  }
  func.func @transform_4(%arg0: i32, %arg1: memref<2x3xi32, #tpu.memory_space<smem>>) -> (i32, i32) {
    %c0_i32 = arith.constant 0 : i32
    %c0_i32_0 = arith.constant 0 : i32
    %c0_i32_1 = arith.constant 0 : i32
    return %c0_i32, %c0_i32_0 : i32, i32
  }
  func.func @transform_5(%arg0: i32, %arg1: memref<2x3xi32, #tpu.memory_space<smem>>) -> (i32, i32) {
    %c0_i32 = arith.constant 0 : i32
    %c0_i32_0 = arith.constant 0 : i32
    %c0_i32_1 = arith.constant 0 : i32
    return %c0_i32, %c0_i32_0 : i32, i32
  }
  func.func @transform_6(%arg0: i32, %arg1: memref<2x3xi32, #tpu.memory_space<smem>>) -> (i32, i32) {
    %c0_i32 = arith.constant 0 : i32
    %c0_i32_0 = arith.constant 0 : i32
    %c0_i32_1 = arith.constant 0 : i32
    return %c0_i32, %c0_i32_0 : i32, i32
  }
  func.func @transform_7(%arg0: i32, %arg1: memref<2x3xi32, #tpu.memory_space<smem>>) -> (i32, i32) {
    %c0_i32 = arith.constant 0 : i32
    %c0_i32_0 = arith.constant 0 : i32
    %c0_i32_1 = arith.constant 0 : i32
    return %c0_i32, %c0_i32_0 : i32, i32
  }
}

</mosaic_0001>

<bundles_post_ra>
// kernel: tpu_custom_call.1
= control target key start
LH: loop header
LB: loop body
LE: loop exit
PB: predicated region body
PF: predicated region fallthrough
CT: control target
= control target key end

     0   :  { %s4550_s0 = inlined_call_operand.hbm [shape: s32[2,3], index: 0, kind: input, shape index: {}]   ;;  %s4551_s1 = inlined_call_operand.hbm [shape: f32[2,784], index: 1, kind: input, shape index: {}]   ;;  %s4552_s2 = inlined_call_operand.hbm [shape: bf16[2,784,512], index: 2, kind: input, shape index: {}]   ;;  %s4553_s3 = inlined_call_operand.hbm [shape: bf16[2,512,128], index: 3, kind: input, shape index: {}]   ;;  %s4554_s4 = inlined_call_operand.hbm [shape: f32[1,512], index: 4, kind: input, shape index: {}]   ;;  %s4555_s5 = inlined_call_operand.hbm [shape: f32[1,128], index: 5, kind: input, shape index: {}]   ;;  %s4556_s6 = inlined_call_operand.vmem [shape: f32[128,10], index: 6, kind: input, shape index: {}]   ;;  %s4557_s7 = inlined_call_operand.hbm [shape: f32[1,10], index: 7, kind: input, shape index: {}]   ;;  %s4558_s8 = inlined_call_operand.hbm [shape: f32[2,10], index: 8, kind: output, shape index: {}]  }
   0x1   :  { %4572 = sst [smem:[#allocation32_spill]] %s4554_s4  ;;  %s3522_s29 = scalar_lea.hbm %s4550_s0, 32 }
   0x2   :  { %4573 = sst [smem:[#allocation33_spill]] %s4556_s6  ;;  %p3523_p0 = scmp.ne.s32.totalorder %s4550_s0, %s3522_s29 }
   0x3   :  { %4574 = sst [smem:[#allocation34_spill]] %s4558_s8  ;;  %p3526_p1 = scmp.lt.u32.totalorder %s3522_s29, %s4550_s0 }
   0x5   :  { %p3528_p2 = pnand %p3526_p1, %p3523_p0 }
   0x7   :  { %3531 = shalt.err (!%p3528_p2)  }
   0x8   :  { %s3812_s12 = smov [#allocation5]  }
   0x9   :  { %14 = dma.hbm_to_smem %s4550_s0, 32, %s3812_s12, [#allocation4] }
   0xa   :  { %3758 = dma.done.wait [#allocation4], 32 }
   0xb   :  { %3759 = vsyncadd [#allocation4], 4294967264 }
   0xc   :  { %16 = sfence }
   0xd   :  { %17 = vsyncpa [#allocation7], 0 }
   0xe   :  { %18 = vsyncpa [#allocation10], 0 }
   0xf   :  { %20 = vsyncpa [#allocation10 + $0x1], 0 }
  0x10   :  { %21 = vsyncpa [#allocation13], 0 }
  0x11   :  { %22 = vsyncpa [#allocation16], 0 }
  0x12   :  { %23 = vsyncpa [#allocation8], 0  ;;  %s3888_s15 = smov 0   ;;  %s3890_s16 = smov 0  }
  0x13   :  { %s3892_s17 = smov 0   ;;  %s3894_s18 = smov 0  }
  0x14   :  { %s3896_s19 = smov 0   ;;  %s3898_s0 = smov 0  }
  0x15   :  { %s3900_s20 = smov 0  }
  0x16 LB: > { %4575 = sst [smem:[#allocation29_spill]] %s3806_s0  ;;  %s3922_s21 = sadd.s32 4294967295, %s3810_s20   ;;  %s3810_s20 = sphi %s3900_s20, %s4615_s20   ;;  %s3806_s0 = sphi %s3898_s0, %s4609_s0   ;;  %s3802_s19 = sphi %s3896_s19, %s4614_s19   ;;  %s3798_s18 = sphi %s3894_s18, %s4613_s18   ;;  %s3794_s17 = sphi %s3892_s17, %s4612_s17   ;;  %s3790_s16 = sphi %s3890_s16, %s4611_s16   ;;  %s3786_s15 = sphi %s3888_s15, %s4610_s15  }
  0x17   : > { %p114_p3 = scmp.ne.s32.totalorder %s3790_s16, %s3786_s15  ;;  %p4559_p4 = scmp.eq.s32.totalorder %s3922_s21, 0 }
  0x18   : > { %p2647_p5 = scmp.ge.s32.totalorder %s3810_s20, 1  ;;  %p230_p6 = scmp.lt.s32.totalorder %s3810_s20, 4 }
  0x19   : > { %p3931_p8 = por %p114_p3, %p4559_p4  ;;  %s3813_s24 = smov [#allocation12]  }
  0x1a   : > { %p3935_p9 = pnand %p2647_p5, %p230_p6  ;;  %s254_s25 = sshll.u32 %s3813_s24, 4  ;;  %s255_s25 = int_to_ptr.vmem [resolvable:$true] %s254_s25 }
  0x1b   : > { %s4576_s22 = scalar_select %p3931_p8, 1, 0 }
  0x1c   : > { %s4578_s23 = scalar_select %p3935_p9, 1, 0 }
  0x1d   : > { %4577 = sst [smem:[#allocation30_spill]] %s4576_s22  ;;  %p3086_p10 = pneg %p3935_p9 }
  0x1e   : > { %s3948_s27 = sadd.s32 1, %s3810_s20   ;;  %s4580_s4 = sld [smem:[#allocation32_spill]] }
  0x1f   : > { %p3943_p11 = pnand %p3086_p10, %p4559_p4 }
  0x21   : > { %s4579_s26 = scalar_select %p3943_p11, 1, 0 }
  0x22   : > { %p3958_p13 = pneg %p3943_p11 }
  0x24   : > { %s3532_s30 = scalar_lea.hbm %s4580_s4, 64 }
  0x25   : > { %p3533_p12 = scmp.ne.s32.totalorder %s4580_s4, %s3532_s30  ;;  %p3539_p2 = scmp.lt.u32.totalorder %s3532_s30, %s4580_s4 }
  0x27   : > { %p3535_p0 = pnand %p3958_p13, %p3533_p12 }
  0x29   : > { %p3536_p1 = pneg %p3535_p0 }
  0x2b   : > { %p3541_p3 = pnand %p3539_p2, %p3536_p1 }
  0x2d   : > { %3544 = shalt.err (!%p3541_p3)
}
  0x2e   : > { %s3545_s14 = scalar_lea.vmem %s255_s25, 64  ;;  %p3553_p7 = scmp.lt.s32.totalorder %s255_s25, %s255_s25 }
  0x2f   : > { %p3546_p5 = scmp.ne.s32.totalorder %s255_s25, %s3545_s14  ;;  %p3554_p4 = scmp.lt.s32.totalorder %s3545_s14, %s3545_s14 }
  0x31   : > { %p3548_p6 = pnand %p3546_p5, %p3958_p13  ;;  %p3555_p8 = por %p3554_p4, %p3553_p7 }
  0x33   : > { %p3549_p10 = pneg %p3548_p6 }
  0x35   : > { %p3556_p9 = pnand %p3555_p8, %p3549_p10 }
  0x37   : > { %3559 = shalt.err (!%p3556_p9)
}
  0x38   : > { %3092 = dma.hbm_to_vmem [thread:$0]  (!%p3943_p11), %s4580_s4, 64, %s255_s25, [#allocation13]  }
  0x39   : > { %s54_s28 = sld [smem:[#allocation5 + %s3810_s20]]  ;;  %s59_s30 = sadd.s32 1, %s3806_s0 }
  0x3a   : > { %s55_s29 = sld [smem:[#allocation5 + %s3948_s27]]  ;;  %p66_p4 = scmp.ne.s32.totalorder %s3806_s0, %s3802_s19 }
  0x3b   : > { %p4568_p7 = scmp.eq.s32.totalorder %s3810_s20, 0  ;;  %p72_p8 = scmp.ne.s32.totalorder %s3802_s19, %s3798_s18 }
  0x3c   : > { %p4567_p9 = scmp.lt.s32.totalorder %s3810_s20, 3  ;;  %p4582_p0 = scmp.eq.s32.totalorder %s3922_s21, 0 }
  0x3d   : > { %p68_p12 = por %p4568_p7, %p66_p4  ;;  %s292_s12 = sand.u32 1, %s3806_s0  }
  0x3e   : > { %p3988_p1 = por %p4582_p0, %p72_p8  ;;  %s3055_s14 = smul.u32 1568, %s292_s12 }
  0x3f   : > { %s3066_s15 = scalar_select %p68_p12, [#allocation5], [#allocation18] }
  0x40   : > { %s4583_s10 = scalar_select %p3988_p1, 1, 0 }
  0x41   : > { %s56_s13 = ssub.s32 %s54_s28, %s55_s29  ;;  %p3999_p3 = pnand %p4567_p9, %p68_p12 }
  0x42   : > { %p57_p2 = scmp.eq.s32.totalorder %s56_s13, 0  ;;  %s4617_s15 = smov (!%p4567_p9, %s3066_s15), [#allocation20] }
  0x43   : > { %s4585_s18 = scalar_select %p3999_p3, 1, 0 }
  0x44   : > { %s3995_s24 = scalar_select %p57_p2, %s3806_s0, %s59_s30  }
  0x45   : > { %s3067_s9 = scalar_select %p68_p12, %s3810_s20, 0 }
  0x46   : > { %4584 = sst [smem:[#allocation31_spill]] %s3995_s24  ;;  %s294_s4 = scalar_lea.vmem [#allocation9], %s3055_s14 }
  0x47   : > { %s4619_s9 = smov (!%p4567_p9, %s3067_s9), 0  ;;  %s302_s25 = sshll.u32 %s294_s4, 4  ;;  %s4010_s25 = int_to_ptr.vmem [resolvable:$true] %s302_s25 }
  0x48   : > { %s4008_s8 = sld [smem:[%s4617_s15 + %s4619_s9]]  ;;  %s3814_s28 = smov [#allocation6]  }
  0x49   : > { %s243_s29 = sshll.u32 %s3814_s28, 4  ;;  %s3815_s30 = smov [#allocation14]   ;;  %s244_s29 = int_to_ptr.vmem [resolvable:$true] %s243_s29 }
  0x4a   : > { %s265_s12 = sshll.u32 %s3815_s30, 4  ;;  %s3560_s0 = scalar_lea.hbm %s4551_s1, 224  ;;  %s4012_s12 = int_to_ptr.vmem [resolvable:$true] %s265_s12 }
  0x4b   : > { %p3561_p5 = scmp.ne.s32.totalorder %s4551_s1, %s3560_s0  ;;  %p3567_p4 = scmp.lt.u32.totalorder %s3560_s0, %s4551_s1 }
  0x4d   : > { %p3563_p6 = pnand %p3561_p5, %p3958_p13 }
  0x4f   : > { %p3564_p10 = pneg %p3563_p6 }
  0x51   : > { %p3569_p8 = pnand %p3567_p4, %p3564_p10 }
  0x53   : > { %3572 = shalt.err (!%p3569_p8)
}
  0x54   : > { %s3573_s14 = scalar_lea.vmem %s244_s29, 224  ;;  %p3581_p9 = scmp.lt.s32.totalorder %s244_s29, %s244_s29 }
  0x55   : > { %p3574_p12 = scmp.ne.s32.totalorder %s244_s29, %s3573_s14  ;;  %p3582_p7 = scmp.lt.s32.totalorder %s3573_s14, %s3573_s14 }
  0x57   : > { %p3576_p0 = pnand %p3574_p12, %p3958_p13  ;;  %p3583_p1 = por %p3582_p7, %p3581_p9 }
  0x59   : > { %p3577_p2 = pneg %p3576_p0 }
  0x5b   : > { %p3584_p3 = pnand %p3583_p1, %p3577_p2 }
  0x5d   : > { %3587 = shalt.err (!%p3584_p3)
}
  0x5e   : > { %3089 = dma.hbm_to_vmem [thread:$0]  (!%p3943_p11), %s4551_s1, 224, %s244_s29, [#allocation7]  }
  0x5f   : > { %s3056_s0 = smul.u32 25088, %s4008_s8  ;;  %s3588_s28 = scalar_lea.hbm %s4555_s5, 16 }
  0x60   : > { %p3589_p5 = scmp.ne.s32.totalorder %s4555_s5, %s3588_s28  ;;  %p3595_p1 = scmp.lt.u32.totalorder %s3588_s28, %s4555_s5 }
  0x62   : > { %p3591_p7 = pnand %p3589_p5, %p3958_p13 }
  0x64   : > { %p3592_p9 = pneg %p3591_p7 }
  0x66   : > { %p3597_p3 = pnand %p3595_p1, %p3592_p9 }
  0x68   : > { %3600 = shalt.err (!%p3597_p3)
}
  0x69   : > { %s3601_s8 = scalar_lea.vmem %s4012_s12, 16  ;;  %s3608_s29 = scalar_lea.vmem %s4012_s12, 32 }
  0x6a   : > { %p3602_p6 = scmp.ne.s32.totalorder %s4012_s12, %s3601_s8  ;;  %p3609_p8 = scmp.lt.s32.totalorder %s4012_s12, %s4012_s12 }
  0x6b   : > { %p3610_p12 = scmp.lt.s32.totalorder %s3608_s29, %s3601_s8 }
  0x6c   : > { %p3604_p10 = pnand %p3602_p6, %p3958_p13 }
  0x6d   : > { %p3611_p0 = por %p3610_p12, %p3609_p8 }
  0x6e   : > { %p3605_p4 = pneg %p3604_p10 }
  0x70   : > { %p3612_p2 = pnand %p3611_p0, %p3605_p4 }
  0x72   : > { %3615 = shalt.err (!%p3612_p2)
}
  0x73   : > { %3095 = dma.hbm_to_vmem [thread:$0]  (!%p3943_p11), %s4555_s5, 16, %s4012_s12, [#allocation13]  }
  0x74   : > { %s4060_s24 = scalar_lea.hbm %s4552_s2, %s3056_s0  ;;  %s3816_s28 = smov [#allocation15]  }
  0x75   : > { %s4062_s30 = sshll.u32 %s3816_s28, 4  ;;  %s4586_s13 = sand.u32 1, %s3810_s20   ;;  %s280_s30 = int_to_ptr.vmem [resolvable:$true] %s4062_s30 }
  0x76   : > { %s4066_s4 = scalar_lea.sflag [#allocation10], %s4586_s13  ;;  %s3616_s9 = scalar_lea.hbm %s4060_s24, 25088 }
  0x77   : > { %p3617_p5 = scmp.ne.s32.totalorder %s4060_s24, %s3616_s9  ;;  %p4587_p7 = scmp.ne.s32.totalorder %s4585_s18, 0 }
  0x78   : > { %s3621_s8 = scalar_lea.hbm %s4552_s2, 50176  ;;  %p3622_p6 = scmp.lt.u32.totalorder %s4060_s24, %s4552_s2 }
  0x79   : > { %p3618_p9 = pneg %p4587_p7  ;;  %p3623_p10 = scmp.lt.u32.totalorder %s3621_s8, %s3616_s9 }
  0x7a   : > { %p3625_p8 = scmp.lt.u32.totalorder %s3616_s9, %s4060_s24 }
  0x7b   : > { %p3619_p1 = pnand %p3618_p9, %p3617_p5  ;;  %p3624_p4 = por %p3623_p10, %p3622_p6 }
  0x7d   : > { %p3620_p3 = pneg %p3619_p1  ;;  %p3626_p12 = por %p3625_p8, %p3624_p4 }
  0x7f   : > { %p3627_p0 = pnand %p3626_p12, %p3620_p3 }
  0x81   : > { %3630 = shalt.err (!%p3627_p0)
}
  0x82   : > { %s3631_s6 = scalar_lea.vmem %s4010_s25, 25088  ;;  %s3817_s22 = smov [#allocation9]  }
  0x83   : > { %p3632_p2 = scmp.ne.s32.totalorder %s4010_s25, %s3631_s6  ;;  %s3636_s15 = sshll.u32 %s3817_s22, 4  ;;  %s3637_s15 = int_to_ptr.vmem [resolvable:$false] %s3636_s15 }
  0x84   : > { %s3638_s28 = scalar_lea.vmem %s3637_s15, 50176  ;;  %p3639_p11 = scmp.lt.s32.totalorder %s4010_s25, %s3637_s15 }
  0x85   : > { %p3634_p5 = pnand %p3632_p2, %p3618_p9  ;;  %p3640_p6 = scmp.lt.s32.totalorder %s3638_s28, %s3631_s6 }
  0x87   : > { %p3635_p1 = pneg %p3634_p5  ;;  %p3641_p10 = por %p3640_p6, %p3639_p11 }
  0x89   : > { %p3642_p4 = pnand %p3641_p10, %p3635_p1 }
  0x8b   : > { %3645 = shalt.err (!%p3642_p4)
}
  0x8c   : > { %s3818_s13 = smov 256   ;;  %s3819_s9 = smov 16  }
  0x8d   : > { %3104 = dma.hbm_to_vmem [thread:$0]  (!%p4587_p7), %s4060_s24, 25088, %s4010_s25, %s4066_s4, %s3818_s13, %s3818_s13, %s3819_s9  }
  0x8e   : > { %s3646_s8 = scalar_lea.hbm %s4557_s7, 16 }
  0x8f   : > { %p3647_p11 = scmp.ne.s32.totalorder %s4557_s7, %s3646_s8  ;;  %p3653_p8 = scmp.lt.u32.totalorder %s3646_s8, %s4557_s7 }
  0x91   : > { %p3649_p9 = pnand %p3647_p11, %p3958_p13 }
  0x93   : > { %p3650_p3 = pneg %p3649_p9 }
  0x95   : > { %p3655_p12 = pnand %p3653_p8, %p3650_p3 }
  0x97   : > { %3658 = shalt.err (!%p3655_p12)
}
  0x98   : > { %s3659_s18 = scalar_lea.vmem %s280_s30, 16  ;;  %s3666_s25 = scalar_lea.vmem %s280_s30, 32 }
  0x99   : > { %p3660_p7 = scmp.ne.s32.totalorder %s280_s30, %s3659_s18  ;;  %p3667_p5 = scmp.lt.s32.totalorder %s280_s30, %s280_s30 }
  0x9a   : > { %p3668_p1 = scmp.lt.s32.totalorder %s3666_s25, %s3659_s18 }
  0x9b   : > { %p3662_p0 = pnand %p3660_p7, %p3958_p13 }
  0x9c   : > { %p3669_p6 = por %p3668_p1, %p3667_p5 }
  0x9d   : > { %p3663_p2 = pneg %p3662_p0 }
  0x9f   : > { %p3670_p10 = pnand %p3669_p6, %p3663_p2 }
  0xa1   : > { %3673 = shalt.err (!%p3670_p10)
}
  0xa2   : > { %p4588_p4 = scmp.ne.s32.totalorder %s4579_s26, 0  ;;  %s82_s11 = sshra.s32 %s3810_s20, 7 }
  0xa3   : > { %s2904_s28 = sshll.u32 %s82_s11, 7  ;;  %s87_s13 = sand.u32 127, %s3810_s20 }
  0xa4   : > { %3098 = dma.hbm_to_vmem [thread:$0]  (!%p4588_p4), %s4557_s7, 16, %s280_s30, [#allocation16]  }
  0xa5   : > { %s2905_s9 = sadd.s32 128, %s2904_s28  ;;  %s4589_s12 = sshra.s32 %s3948_s27, 7 }
  0xa6   : > { %s2906_s0 = sshll.u32 %s4589_s12, 7  ;;  %s88_s26 = sadd.s32 %s2905_s9, %s87_s13 }
  0xa7   : > { %s2907_s8 = sadd.s32 128, %s2906_s0  ;;  %s89_s29 = sld [smem:[#allocation5 + %s88_s26]] }
  0xa8   : > { %s95_s14 = sand.u32 127, %s3948_s27  ;;  %p108_p13 = scmp.ne.s32.totalorder %s3794_s17, %s3790_s16 }
  0xa9   : > { %s96_s6 = sadd.s32 %s2907_s8, %s95_s14  ;;  %p4590_p11 = scmp.eq.s32.totalorder %s3810_s20, 0 }
  0xaa   : > { %s97_s22 = sld [smem:[#allocation5 + %s96_s6]]  ;;  %s314_s30 = sand.u32 1, %s3794_s17  }
  0xab   : > { %p110_p9 = por %p108_p13, %p4590_p11  ;;  %s101_s24 = sadd.s32 1, %s3794_s17 }
  0xac   : > { %s2654_s15 = sshll.u32 %s314_s30, 8  ;;  %p4591_p8 = scmp.lt.s32.totalorder %s3810_s20, 3 }
  0xad   : > { %s3069_s18 = scalar_select %p110_p9, [#allocation5], [#allocation19] }
  0xae   : > { %s4621_s26 = smov (!%p110_p9, %s88_s26), 0  ;;  %p4592_p12 = pmov %p4591_p8 }
  0xaf   : > { %s4623_s18 = smov (!%p4591_p8, %s3069_s18), [#allocation21]  ;;  %p4593_p7 = pmov %p4591_p8 }
  0xb0   : > { %s98_s25 = ssub.s32 %s89_s29, %s97_s22  ;;  %s4625_s26 = smov (!%p4592_p12, %s4621_s26), 0 }
  0xb1   : > { %p99_p3 = scmp.eq.s32.totalorder %s98_s25, 0  ;;  %p4133_p0 = pnand %p4593_p7, %p110_p9 }
  0xb2   : > { %s324_s13 = sld [smem:[%s4623_s18 + %s4625_s26]]  ;;  %s316_s9 = scalar_lea.vmem [#allocation11], %s2654_s15 }
  0xb3   : > { %s4127_s11 = scalar_select %p99_p3, %s3794_s17, %s101_s24  }
  0xb4   : > { %s331_s12 = sshll.u32 %s316_s9, 4  ;;  %p3676_p5 = pneg %p4133_p0  ;;  %s4137_s12 = int_to_ptr.vmem [resolvable:$true] %s331_s12 }
  0xb5   : > { %s3679_s22 = scalar_lea.hbm %s4553_s3, 8192 }
  0xb8   : > { %s2910_s0 = sshll.u32 %s324_s13, 12 }
  0xb9   : > { %s4142_s14 = scalar_lea.hbm %s4553_s3, %s2910_s0 }
  0xba   : > { %s3674_s20 = scalar_lea.hbm %s4142_s14, 4096  ;;  %p3680_p10 = scmp.lt.u32.totalorder %s4142_s14, %s4553_s3 }
  0xbb   : > { %p3675_p2 = scmp.ne.s32.totalorder %s4142_s14, %s3674_s20  ;;  %p3681_p4 = scmp.lt.u32.totalorder %s3679_s22, %s3674_s20 }
  0xbc   : > { %p3683_p11 = scmp.lt.u32.totalorder %s3674_s20, %s4142_s14 }
  0xbd   : > { %p3677_p1 = pnand %p3676_p5, %p3675_p2  ;;  %p3682_p13 = por %p3681_p4, %p3680_p10 }
  0xbf   : > { %p3678_p6 = pneg %p3677_p1  ;;  %p3684_p9 = por %p3683_p11, %p3682_p13 }
  0xc1   : > { %p3685_p3 = pnand %p3684_p9, %p3678_p6 }
  0xc3   : > { %3688 = shalt.err (!%p3685_p3)
}
  0xc4   : > { %s3689_s25 = scalar_lea.vmem %s4137_s12, 4096  ;;  %s3820_s24 = smov [#allocation11]  }
  0xc5   : > { %p3690_p8 = scmp.ne.s32.totalorder %s4137_s12, %s3689_s25  ;;  %s3694_s15 = sshll.u32 %s3820_s24, 4  ;;  %s3695_s15 = int_to_ptr.vmem [resolvable:$false] %s3694_s15 }
  0xc6   : > { %s3696_s13 = scalar_lea.vmem %s3695_s15, 8192  ;;  %p3697_p2 = scmp.lt.s32.totalorder %s4137_s12, %s3695_s15 }
  0xc7   : > { %p3692_p12 = pnand %p3690_p8, %p3676_p5  ;;  %p3698_p1 = scmp.lt.s32.totalorder %s3696_s13, %s3689_s25 }
  0xc9   : > { %p3693_p7 = pneg %p3692_p12  ;;  %p3699_p10 = por %p3698_p1, %p3697_p2 }
  0xcb   : > { %p3700_p4 = pnand %p3699_p10, %p3693_p7 }
  0xcd   : > { %3703 = shalt.err (!%p3700_p4)
}
  0xce   : > { %s3821_s9 = smov 64   ;;  %s3822_s0 = smov 4  }
  0xcf   : > { %3109 = dma.hbm_to_vmem [thread:$0]  (!%p4133_p0), %s4142_s14, 4096, %s4137_s12, %s4066_s4, %s3821_s9, %s3821_s9, %s3822_s0  }
  0xd0   : > { %p4595_p5 = scmp.ne.s32.totalorder %s4578_s23, 0 }
  0xd1   : > { %p4596_p6 = scmp.eq.s32.totalorder (!%p4595_p5), %s3922_s21, 0 }
  0xd2   : > { %343 = sbr.rel (%p4595_p5) target bundleno = 1218 (0x4c2), region = 48 }
  0xd9   : > { %3761 = dma.done.wait (%p4596_p6), [#allocation7], 224   ;;  %p4597_p13 = pmov %p4596_p6 }
  0xda   : > { %s349_s8 = sand.u32 1, %s3922_s21   ;;  %s351_s29 = sand.u32 1, %s3802_s19  }
  0xdb   : > { %3763 = vsyncadd (%p4597_p13), [#allocation7], 4294967072  ;;  %s3057_s20 = smul.u32 1568, %s351_s29  ;;  %s350_s26 = scalar_lea.sflag [#allocation10], %s349_s8 }
  0xdc   : > { %p4598_p11 = scmp.ne.s32.totalorder %s4583_s10, 0 }
  0xdd   : > { %s4178_s6 = scalar_lea.vmem [#allocation9], %s3057_s20 }
  0xde   : > { %3765 = dma.done.wait (%p4598_p11), %s350_s26, 25088  }
  0xdf   : > { %3767 = vsyncadd (%p4598_p11), %s350_s26, 4294942208  ;;  %s4599_s23 = sld [smem:[#allocation30_spill]]  ;;  %s360_s4 = sand.u32 1, %s3790_s16  }
  0xe0   : > { %s2660_s28 = sshll.u32 %s360_s4, 8 }
  0xe1   : > { %s4185_s12 = scalar_lea.vmem [#allocation11], %s2660_s28 }
  0xe5   : > { %p4600_p0 = scmp.ne.s32.totalorder %s4599_s23, 0 }
  0xe7   : > { %3769 = dma.done.wait (%p4600_p0), %s350_s26, 4096  }
  0xe8   : > { %3771 = vsyncadd (%p4600_p0), %s350_s26, 4294963200  ;;  %p4601_p9 = pmov %p4596_p6 }
  0xe9   : > { %p4602_p3 = pmov %p4596_p6 }
  0xea   : > { %3773 = dma.done.wait (%p4601_p9), [#allocation13], 80  }
  0xeb   : > { %3775 = vsyncadd (%p4602_p3), [#allocation13], 4294967216  ;;  %p4603_p8 = pmov %p4602_p3 }
  0xec   : > { %p4604_p12 = pmov %p4602_p3 }
  0xed   : > { %3777 = dma.done.wait (%p4603_p8), [#allocation16], 16  }
  0xee   : > { %3779 = vsyncadd (%p4604_p12), [#allocation16], 4294967280  ;;  %p4605_p7 = scmp.ne.s32.totalorder %s3922_s21, 0 }
  0xef   : > { %v3823_v0 = vmov (!%p4605_p7), 0.0  }
  0xf0   : > { %418 = sbr.rel (%p4605_p7) target bundleno = 247 (0xf7), region = 76  ;;  %419 = vst [vmem:[#allocation2] sm:$0xff] (!%p4605_p7), %v3823_v0  ;;  %420 = vst [vmem:[#allocation3] sm:$0x3] (!%p4605_p7), %v3823_v0 }
  0xf7 PF: > { %p2665_p2 = scmp.ge.s32.totalorder %s3922_s21, 2 }
  0xf8   : > { %v3194_v1 = vld [vmem:[%s4178_s6 + $0x4] ss:$16 sps:$4 sm:$0xff] (!%p2665_p2)   ;;  %v3196_v2 = vld [vmem:[%s4178_s6 + $0xc] ss:$16 sps:$4 sm:$0xff] (!%p2665_p2)   ;;  %v3198_v3 = vld [vmem:[%s4178_s6] ss:$16 sps:$4 sm:$0xff] (!%p2665_p2)   ;;  %v433_v39 = vlaneseq (!%p2665_p2) }
  0xf9   : > { %424 = sbr.rel (%p2665_p2) target bundleno = 675 (0x2a3), region = 80  ;;  %1657 = vmatprep.subr.bf16.mxu0 (!%p2665_p2), %v3194_v1  ;;  %v3199_v4 = vld [vmem:[%s4178_s6 + $0x8] ss:$16 sps:$4 sm:$0xff] (!%p2665_p2)   ;;  %1821 = vmatprep.subr.bf16.mxu1 (!%p2665_p2), %v3196_v2  ;;  %v3200_v5 = vld [vmem:[%s4178_s6 + $0x24] ss:$16 sps:$4 sm:$0xff] (!%p2665_p2)   ;;  %vm1653_vm0 = vcmask (!%p2665_p2), 130048  }
  0xfa   : > { %1658 = vmatpush1.bf16.msra.mxu0 (!%p2665_p2), %v3198_v3  ;;  %1822 = vmatpush1.bf16.msra.mxu1 (!%p2665_p2), %v3199_v4  ;;  %v3202_v6 = vld [vmem:[%s4178_s6 + $0x2c] ss:$16 sps:$4 sm:$0xff] (!%p2665_p2)   ;;  %v3204_v7 = vld [vmem:[%s4178_s6 + $0x20] ss:$16 sps:$4 sm:$0xff] (!%p2665_p2)   ;;  %v3205_v8 = vld [vmem:[%s4178_s6 + $0x28] ss:$16 sps:$4 sm:$0xff] (!%p2665_p2)  }
  0xfb   : > { %1659 = vmatprep.subr.bf16.mxu0 (!%p2665_p2), %v3200_v5  ;;  %1823 = vmatprep.subr.bf16.mxu1 (!%p2665_p2), %v3202_v6  ;;  %v3206_v9 = vld [vmem:[%s4178_s6 + $0x44] ss:$16 sps:$4 sm:$0xff] (!%p2665_p2)   ;;  %v3208_v10 = vld [vmem:[%s4178_s6 + $0x4c] ss:$16 sps:$4 sm:$0xff] (!%p2665_p2)   ;;  %v3210_v11 = vld [vmem:[%s4178_s6 + $0x40] ss:$16 sps:$4 sm:$0xff] (!%p2665_p2)  }
  0xfc   : > { %v3211_v12 = vld [vmem:[%s4178_s6 + $0x48] ss:$16 sps:$4 sm:$0xff] (!%p2665_p2)   ;;  %v3212_v13 = vld [vmem:[%s4178_s6 + $0x64] ss:$16 sps:$4 sm:$0xff] (!%p2665_p2)   ;;  %v3214_v14 = vld [vmem:[%s4178_s6 + $0x6c] ss:$16 sps:$4 sm:$0xff] (!%p2665_p2)  }
  0xfd   : > { %v3216_v15 = vld [vmem:[%s4178_s6 + $0x60] ss:$16 sps:$4 sm:$0xff] (!%p2665_p2)   ;;  %v3217_v16 = vld [vmem:[%s4178_s6 + $0x68] ss:$16 sps:$4 sm:$0xff] (!%p2665_p2)   ;;  %v3218_v17 = vld [vmem:[%s4178_s6 + $0x84] ss:$16 sps:$4 sm:$0xff] (!%p2665_p2)  }
  0xfe   : > { %1660 = vmatpush1.bf16.msra.mxu0 (!%p2665_p2), %v3204_v7  ;;  %1824 = vmatpush1.bf16.msra.mxu1 (!%p2665_p2), %v3205_v8  ;;  %v3220_v18 = vld [vmem:[%s4178_s6 + $0x8c] ss:$16 sps:$4 sm:$0xff] (!%p2665_p2)   ;;  %v3222_v19 = vld [vmem:[%s4178_s6 + $0x80] ss:$16 sps:$4 sm:$0xff] (!%p2665_p2)   ;;  %v3223_v20 = vld [vmem:[%s4178_s6 + $0x88] ss:$16 sps:$4 sm:$0xff] (!%p2665_p2)  }
  0xff   : > { %1661 = vmatprep.subr.bf16.mxu0 (!%p2665_p2), %v3206_v9  ;;  %1825 = vmatprep.subr.bf16.mxu1 (!%p2665_p2), %v3208_v10  ;;  %v3224_v21 = vld [vmem:[%s4178_s6 + $0xa4] ss:$16 sps:$4 sm:$0xff] (!%p2665_p2)   ;;  %v3226_v22 = vld [vmem:[%s4178_s6 + $0xac] ss:$16 sps:$4 sm:$0xff] (!%p2665_p2)   ;;  %v3228_v23 = vld [vmem:[%s4178_s6 + $0xa0] ss:$16 sps:$4 sm:$0xff] (!%p2665_p2)  }
 0x100   : > { %v3229_v24 = vld [vmem:[%s4178_s6 + $0xa8] ss:$16 sps:$4 sm:$0xff]   ;;  %v3230_v25 = vld [vmem:[%s4178_s6 + $0xc4] ss:$16 sps:$4 sm:$0xff]   ;;  %v3232_v26 = vld [vmem:[%s4178_s6 + $0xcc] ss:$16 sps:$4 sm:$0xff]  }
 0x101   : > { %v3234_v27 = vld [vmem:[%s4178_s6 + $0xc0] ss:$16 sps:$4 sm:$0xff]   ;;  %v3235_v28 = vld [vmem:[%s4178_s6 + $0xc8] ss:$16 sps:$4 sm:$0xff]   ;;  %v3236_v29 = vld [vmem:[%s4178_s6 + $0xe4] ss:$16 sps:$4 sm:$0xff]  }
 0x102   : > { %1662 = vmatpush1.bf16.msra.mxu0 %v3210_v11  ;;  %1826 = vmatpush1.bf16.msra.mxu1 %v3211_v12  ;;  %v3238_v30 = vld [vmem:[%s4178_s6 + $0xec] ss:$16 sps:$4 sm:$0xff]   ;;  %v3240_v31 = vld [vmem:[%s4178_s6 + $0xe0] ss:$16 sps:$4 sm:$0xff]   ;;  %v3241_v32 = vld [vmem:[%s4178_s6 + $0xe8] ss:$16 sps:$4 sm:$0xff]  }
 0x103   : > { %1663 = vmatprep.subr.bf16.mxu0 %v3212_v13  ;;  %1827 = vmatprep.subr.bf16.mxu1 %v3214_v14  ;;  %v3242_v33 = vld [vmem:[%s4178_s6 + $0x104] ss:$16 sps:$4 sm:$0xff]   ;;  %v3244_v34 = vld [vmem:[%s4178_s6 + $0x10c] ss:$16 sps:$4 sm:$0xff]   ;;  %v3246_v35 = vld [vmem:[%s4178_s6 + $0x100] ss:$16 sps:$4 sm:$0xff]  }
 0x104   : > { %v3247_v36 = vld [vmem:[%s4178_s6 + $0x108] ss:$16 sps:$4 sm:$0xff]   ;;  %v3824_v37 = vmov 1983009808   ;;  %v3248_v40 = vld [vmem:[%s4178_s6 + $0x124] ss:$16 sps:$4 sm:$0xff]  }
 0x105   : > { %v431_v38 = vunpack.c.l.s4 %v3824_v37  ;;  %v3250_v41 = vld [vmem:[%s4178_s6 + $0x12c] ss:$16 sps:$4 sm:$0xff]   ;;  %v3252_v42 = vld [vmem:[%s4178_s6 + $0x120] ss:$16 sps:$4 sm:$0xff]   ;;  %v434_v44 = vshrl.u32 %v433_v39, 7 }
 0x106   : > { %1664 = vmatpush1.bf16.msra.mxu0 %v3216_v15  ;;  %1828 = vmatpush1.bf16.msra.mxu1 %v3217_v16  ;;  %v3253_v45 = vld [vmem:[%s4178_s6 + $0x128] ss:$16 sps:$4 sm:$0xff]   ;;  %v3254_v46 = vld [vmem:[%s4178_s6 + $0x144] ss:$16 sps:$4 sm:$0xff]   ;;  %v3256_v47 = vld [vmem:[%s4178_s6 + $0x14c] ss:$16 sps:$4 sm:$0xff]  }
 0x107   : > { %1665 = vmatprep.subr.bf16.mxu0 %v3218_v17  ;;  %1829 = vmatprep.subr.bf16.mxu1 %v3220_v18  ;;  %v432_v43 = vunpack.c.0.s8 %v431_v38  ;;  %v3258_v48 = vld [vmem:[%s4178_s6 + $0x140] ss:$16 sps:$4 sm:$0xff]   ;;  %v3259_v49 = vld [vmem:[%s4178_s6 + $0x148] ss:$16 sps:$4 sm:$0xff]   ;;  %v3260_v51 = vld [vmem:[%s4178_s6 + $0x164] ss:$16 sps:$4 sm:$0xff]  }
 0x108   : > { %v3262_v52 = vld [vmem:[%s4178_s6 + $0x16c] ss:$16 sps:$4 sm:$0xff]   ;;  %v425_v53 = vld [vmem:[#allocation6] sm:$0xff] }
 0x109   : > { %v4246_v50 = vsub.s32 %v432_v43, %v434_v44  ;;  %v3264_v54 = vld [vmem:[%s4178_s6 + $0x160] ss:$16 sps:$4 sm:$0xff]   ;;  %v3265_v56 = vld [vmem:[%s4178_s6 + $0x168] ss:$16 sps:$4 sm:$0xff]   ;;  %v3266_v57 = vld [vmem:[%s4178_s6 + $0x184] ss:$16 sps:$4 sm:$0xff]   ;;  %v429_v5 = vcombine.high %v425_v53, %v425_v53 }
 0x10a   : > { %1666 = vmatpush1.bf16.msra.mxu0 %v3222_v19  ;;  %1830 = vmatpush1.bf16.msra.mxu1 %v3223_v20  ;;  %v3268_v58 = vld [vmem:[%s4178_s6 + $0x18c] ss:$16 sps:$4 sm:$0xff]   ;;  %v3270_v60 = vld [vmem:[%s4178_s6 + $0x180] ss:$16 sps:$4 sm:$0xff]   ;;  %v3271_v62 = vld [vmem:[%s4178_s6 + $0x188] ss:$16 sps:$4 sm:$0xff]  }
 0x10b   : > { %1667 = vmatprep.subr.bf16.mxu0 %v3224_v21  ;;  %1831 = vmatprep.subr.bf16.mxu1 %v3226_v22  ;;  %v436_v55 = vrot.slane %v425_v53, %v4246_v50  ;;  %v3272_v63 = vld [vmem:[%s4178_s6 + $0x1a4] ss:$16 sps:$4 sm:$0xff]   ;;  %v3274_v0 = vld [vmem:[%s4178_s6 + $0x1ac] ss:$16 sps:$4 sm:$0xff]   ;;  %v3276_v1 = vld [vmem:[%s4178_s6 + $0x1a0] ss:$16 sps:$4 sm:$0xff]   ;;  %v4268_v10 = vrot.slane %v429_v5, %v4246_v50 }
 0x10c   : > { %v3277_v2 = vld [vmem:[%s4178_s6 + $0x1a8] ss:$16 sps:$4 sm:$0xff]   ;;  %v3278_v3 = vld [vmem:[%s4178_s6 + $0x1c4] ss:$16 sps:$4 sm:$0xff]   ;;  %v3280_v4 = vld [vmem:[%s4178_s6 + $0x1cc] ss:$16 sps:$4 sm:$0xff]  }
 0x10d   : > { %v444_v59 = vcombine.high %v436_v55, %v436_v55  ;;  %v3282_v6 = vld [vmem:[%s4178_s6 + $0x1c0] ss:$16 sps:$4 sm:$0xff]   ;;  %v3283_v7 = vld [vmem:[%s4178_s6 + $0x1c8] ss:$16 sps:$4 sm:$0xff]   ;;  %v3284_v8 = vld [vmem:[%s4178_s6 + $0x1e4] ss:$16 sps:$4 sm:$0xff]   ;;  %v445_v15 = vcombine.high %v4268_v10, %v4268_v10  ;;  %v469_v17 = vpack.c.bf16 %v436_v55, %v436_v55 }
 0x10e   : > { %1668 = vmatpush1.bf16.msra.mxu0 %v3228_v23  ;;  %1832 = vmatpush1.bf16.msra.mxu1 %v3229_v24  ;;  %v3286_v9 = vld [vmem:[%s4178_s6 + $0x1ec] ss:$16 sps:$4 sm:$0xff]   ;;  %v3288_v11 = vld [vmem:[%s4178_s6 + $0x1e0] ss:$16 sps:$4 sm:$0xff]   ;;  %v3289_v12 = vld [vmem:[%s4178_s6 + $0x1e8] ss:$16 sps:$4 sm:$0xff]  }
 0x10f   : > { %1669 = vmatprep.subr.bf16.mxu0 %v3230_v25  ;;  %1833 = vmatprep.subr.bf16.mxu1 %v3232_v26  ;;  %v470_v61 = vpack.c.bf16 %v444_v59, %v444_v59  ;;  %v3293_v13 = vld [vmem:[%s4178_s6 + $0x204] ss:$16 sps:$4 sm:$0xff]   ;;  %v3296_v14 = vld [vmem:[%s4178_s6 + $0x20c] ss:$16 sps:$4 sm:$0xff]   ;;  %v3291_v16 = vld [vmem:[%s4178_s6 + $0x200] ss:$16 sps:$4 sm:$0xff]   ;;  %v472_v21 = vpack.c.bf16 %v445_v15, %v445_v15 }
 0x110   : > { %v3294_v18 = vld [vmem:[%s4178_s6 + $0x208] ss:$16 sps:$4 sm:$0xff]   ;;  %v3299_v19 = vld [vmem:[%s4178_s6 + $0x224] ss:$16 sps:$4 sm:$0xff]   ;;  %v3302_v20 = vld [vmem:[%s4178_s6 + $0x22c] ss:$16 sps:$4 sm:$0xff]  }
 0x111   : > { %1689 = vmatprep.mubr.bf16.mxu0 %v470_v61  ;;  %1853 = vmatprep.mubr.bf16.mxu1 %v470_v61  ;;  %v3297_v22 = vld [vmem:[%s4178_s6 + $0x220] ss:$16 sps:$4 sm:$0xff]   ;;  %v3300_v23 = vld [vmem:[%s4178_s6 + $0x228] ss:$16 sps:$4 sm:$0xff]   ;;  %v3305_v24 = vld [vmem:[%s4178_s6 + $0x244] ss:$16 sps:$4 sm:$0xff]  }
 0x112   : > { %1670 = vmatpush1.bf16.msra.mxu0 %v3234_v27  ;;  %1834 = vmatpush1.bf16.msra.mxu1 %v3235_v28  ;;  %v3308_v25 = vld [vmem:[%s4178_s6 + $0x24c] ss:$16 sps:$4 sm:$0xff]   ;;  %v3303_v26 = vld [vmem:[%s4178_s6 + $0x240] ss:$16 sps:$4 sm:$0xff]   ;;  %v3306_v27 = vld [vmem:[%s4178_s6 + $0x248] ss:$16 sps:$4 sm:$0xff]  }
 0x113   : > { %1671 = vmatprep.subr.bf16.mxu0 %v3236_v29  ;;  %1835 = vmatprep.subr.bf16.mxu1 %v3238_v30  ;;  %v3311_v28 = vld [vmem:[%s4178_s6 + $0x264] ss:$16 sps:$4 sm:$0xff]   ;;  %v3314_v29 = vld [vmem:[%s4178_s6 + $0x26c] ss:$16 sps:$4 sm:$0xff]   ;;  %v3309_v30 = vld [vmem:[%s4178_s6 + $0x260] ss:$16 sps:$4 sm:$0xff]  }
 0x114   : > { %v3326_v37 = vld [vmem:[%s4178_s6 + $0x2ac] ss:$16 sps:$4 sm:$0xff]   ;;  %v3321_v38 = vld [vmem:[%s4178_s6 + $0x2a0] ss:$16 sps:$4 sm:$0xff]   ;;  %v3324_v39 = vld [vmem:[%s4178_s6 + $0x2a8] ss:$16 sps:$4 sm:$0xff]  }
 0x115   : > { %v3330_v43 = vld [vmem:[%s4178_s6 + $0x2c8] ss:$16 sps:$4 sm:$0xff]   ;;  %v3335_v44 = vld [vmem:[%s4178_s6 + $0x2e4] ss:$16 sps:$4 sm:$0xff]   ;;  %v3345_v55 = vld [vmem:[%s4178_s6 + $0x320] ss:$16 sps:$4 sm:$0xff]  }
 0x116   : > { %1672 = vmatpush1.bf16.msra.mxu0 %v3240_v31  ;;  %1836 = vmatpush1.bf16.msra.mxu1 %v3241_v32  ;;  %v3312_v31 = vld [vmem:[%s4178_s6 + $0x268] ss:$16 sps:$4 sm:$0xff]   ;;  %v3317_v32 = vld [vmem:[%s4178_s6 + $0x284] ss:$16 sps:$4 sm:$0xff]   ;;  %v3351_v59 = vld [vmem:[%s4178_s6 + $0x340] ss:$16 sps:$4 sm:$0xff]  }
 0x117   : > { %1673 = vmatprep.subr.bf16.mxu0 %v3242_v33  ;;  %1837 = vmatprep.subr.bf16.mxu1 %v3244_v34  ;;  %v3320_v33 = vld [vmem:[%s4178_s6 + $0x28c] ss:$16 sps:$4 sm:$0xff]   ;;  %v3315_v34 = vld [vmem:[%s4178_s6 + $0x280] ss:$16 sps:$4 sm:$0xff]   ;;  %v3347_v53 = vld [vmem:[%s4178_s6 + $0x324] ss:$16 sps:$4 sm:$0xff]  }
 0x118   : > { %v3359_v61 = vld [vmem:[%s4178_s6 + $0x364] ss:$16 sps:$4 sm:$0xff]   ;;  %v3386_v15 = vld [vmem:[%s4178_s6 + $0x3ec] ss:$16 sps:$4 sm:$0xff]  }
 0x119   : > { %v3371_v5 = vld [vmem:[%s4178_s6 + $0x3a4] ss:$16 sps:$4 sm:$0xff]  }
 0x11a   : > { %1674 = vmatpush1.bf16.msra.mxu0 %v3246_v35  ;;  %1838 = vmatpush1.bf16.msra.mxu1 %v3247_v36  ;;  %v3318_v35 = vld [vmem:[%s4178_s6 + $0x288] ss:$16 sps:$4 sm:$0xff]   ;;  %v3323_v36 = vld [vmem:[%s4178_s6 + $0x2a4] ss:$16 sps:$4 sm:$0xff]  }
 0x11b   : > { %1675 = vmatprep.subr.bf16.mxu0 %v3248_v40  ;;  %1839 = vmatprep.subr.bf16.mxu1 %v3250_v41  ;;  %v3329_v40 = vld [vmem:[%s4178_s6 + $0x2c4] ss:$16 sps:$4 sm:$0xff]   ;;  %v3332_v41 = vld [vmem:[%s4178_s6 + $0x2cc] ss:$16 sps:$4 sm:$0xff]  }
 0x11e   : > { %1676 = vmatpush1.bf16.msra.mxu0 %v3252_v42  ;;  %1840 = vmatpush1.bf16.msra.mxu1 %v3253_v45  ;;  %v3327_v42 = vld [vmem:[%s4178_s6 + $0x2c0] ss:$16 sps:$4 sm:$0xff]   ;;  %v3338_v45 = vld [vmem:[%s4178_s6 + $0x2ec] ss:$16 sps:$4 sm:$0xff]  }
 0x11f   : > { %1677 = vmatprep.subr.bf16.mxu0 %v3254_v46  ;;  %1841 = vmatprep.subr.bf16.mxu1 %v3256_v47  ;;  %v3333_v46 = vld [vmem:[%s4178_s6 + $0x2e0] ss:$16 sps:$4 sm:$0xff]   ;;  %v3336_v47 = vld [vmem:[%s4178_s6 + $0x2e8] ss:$16 sps:$4 sm:$0xff]  }
 0x122   : > { %1678 = vmatpush1.bf16.msra.mxu0 %v3258_v48  ;;  %1842 = vmatpush1.bf16.msra.mxu1 %v3259_v49  ;;  %v3341_v48 = vld [vmem:[%s4178_s6 + $0x304] ss:$16 sps:$4 sm:$0xff]   ;;  %v3344_v49 = vld [vmem:[%s4178_s6 + $0x30c] ss:$16 sps:$4 sm:$0xff]  }
 0x123   : > { %1679 = vmatprep.subr.bf16.mxu0 %v3260_v51  ;;  %1843 = vmatprep.subr.bf16.mxu1 %v3262_v52  ;;  %v3339_v51 = vld [vmem:[%s4178_s6 + $0x300] ss:$16 sps:$4 sm:$0xff]   ;;  %v3342_v52 = vld [vmem:[%s4178_s6 + $0x308] ss:$16 sps:$4 sm:$0xff]  }
 0x126   : > { %1680 = vmatpush1.bf16.msra.mxu0 %v3264_v54  ;;  %1844 = vmatpush1.bf16.msra.mxu1 %v3265_v56  ;;  %v3350_v54 = vld [vmem:[%s4178_s6 + $0x32c] ss:$16 sps:$4 sm:$0xff]   ;;  %v3348_v56 = vld [vmem:[%s4178_s6 + $0x328] ss:$16 sps:$4 sm:$0xff]  }
 0x127   : > { %1681 = vmatprep.subr.bf16.mxu0 %v3266_v57  ;;  %1845 = vmatprep.subr.bf16.mxu1 %v3268_v58  ;;  %v3353_v57 = vld [vmem:[%s4178_s6 + $0x344] ss:$16 sps:$4 sm:$0xff]   ;;  %v3356_v58 = vld [vmem:[%s4178_s6 + $0x34c] ss:$16 sps:$4 sm:$0xff]  }
 0x12a   : > { %1682 = vmatpush1.bf16.msra.mxu0 %v3270_v60  ;;  %1846 = vmatpush1.bf16.msra.mxu1 %v3271_v62  ;;  %v3354_v60 = vld [vmem:[%s4178_s6 + $0x348] ss:$16 sps:$4 sm:$0xff]   ;;  %v3362_v62 = vld [vmem:[%s4178_s6 + $0x36c] ss:$16 sps:$4 sm:$0xff]  }
 0x12b   : > { %1683 = vmatprep.subr.bf16.mxu0 %v3272_v63  ;;  %1847 = vmatprep.subr.bf16.mxu1 %v3274_v0  ;;  %v3357_v63 = vld [vmem:[%s4178_s6 + $0x360] ss:$16 sps:$4 sm:$0xff]   ;;  %v3360_v0 = vld [vmem:[%s4178_s6 + $0x368] ss:$16 sps:$4 sm:$0xff]  }
 0x12e   : > { %1684 = vmatpush1.bf16.msra.mxu0 %v3276_v1  ;;  %1848 = vmatpush1.bf16.msra.mxu1 %v3277_v2  ;;  %v3365_v1 = vld [vmem:[%s4178_s6 + $0x384] ss:$16 sps:$4 sm:$0xff]   ;;  %v3368_v2 = vld [vmem:[%s4178_s6 + $0x38c] ss:$16 sps:$4 sm:$0xff]  }
 0x12f   : > { %1685 = vmatprep.subr.bf16.mxu0 %v3278_v3  ;;  %1849 = vmatprep.subr.bf16.mxu1 %v3280_v4  ;;  %v3363_v3 = vld [vmem:[%s4178_s6 + $0x380] ss:$16 sps:$4 sm:$0xff]   ;;  %v3366_v4 = vld [vmem:[%s4178_s6 + $0x388] ss:$16 sps:$4 sm:$0xff]  }
 0x132   : > { %1686 = vmatpush1.bf16.msra.mxu0 %v3282_v6  ;;  %1850 = vmatpush1.bf16.msra.mxu1 %v3283_v7  ;;  %v3374_v6 = vld [vmem:[%s4178_s6 + $0x3ac] ss:$16 sps:$4 sm:$0xff]   ;;  %v3369_v7 = vld [vmem:[%s4178_s6 + $0x3a0] ss:$16 sps:$4 sm:$0xff]  }
 0x133   : > { %1687 = vmatprep.subr.bf16.mxu0 %v3284_v8  ;;  %1851 = vmatprep.subr.bf16.mxu1 %v3286_v9  ;;  %v3372_v8 = vld [vmem:[%s4178_s6 + $0x3a8] ss:$16 sps:$4 sm:$0xff]   ;;  %v3377_v9 = vld [vmem:[%s4178_s6 + $0x3c4] ss:$16 sps:$4 sm:$0xff]  }
 0x136   : > { %1688 = vmatpush1.bf16.msra.mxu0 %v3288_v11  ;;  %1852 = vmatpush1.bf16.msra.mxu1 %v3289_v12  ;;  %v3380_v11 = vld [vmem:[%s4178_s6 + $0x3cc] ss:$16 sps:$4 sm:$0xff]   ;;  %v3375_v12 = vld [vmem:[%s4178_s6 + $0x3c0] ss:$16 sps:$4 sm:$0xff]  }
 0x137   : > { %1698 = vmatprep.subr.bf16.mxu0 %v3293_v13  ;;  %1862 = vmatprep.subr.bf16.mxu1 %v3296_v14  ;;  %v3378_v13 = vld [vmem:[%s4178_s6 + $0x3c8] ss:$16 sps:$4 sm:$0xff]   ;;  %v3383_v14 = vld [vmem:[%s4178_s6 + $0x3e4] ss:$16 sps:$4 sm:$0xff]  }
 0x139   : > { %1690 = vmatmul.mubr.bf16.vlgmr.msra.gmra.mrb[0].mxu0 %v469_v17  ;;  %1854 = vmatmul.mubr.bf16.vlgmr.msra.gmra.mrb[0].mxu1 %v469_v17  ;;  %v3384_v17 = vld [vmem:[%s4178_s6 + $0x3e8] ss:$16 sps:$4 sm:$0xff]  }
 0x13a   : > { %1699 = vmatpush1.bf16.msra.mxu0 %v3291_v16  ;;  %1863 = vmatpush1.bf16.msra.mxu1 %v3294_v18  ;;  %v3381_v16 = vld [vmem:[%s4178_s6 + $0x3e0] ss:$16 sps:$4 sm:$0xff]   ;;  %v3389_v18 = vld [vmem:[%s4178_s6 + $0x404] ss:$16 sps:$4 sm:$0xff]  }
 0x13b   : > { %1700 = vmatprep.subr.bf16.mxu0 %v3299_v19  ;;  %1864 = vmatprep.subr.bf16.mxu1 %v3302_v20  ;;  %v3392_v19 = vld [vmem:[%s4178_s6 + $0x40c] ss:$16 sps:$4 sm:$0xff]   ;;  %v3387_v20 = vld [vmem:[%s4178_s6 + $0x400] ss:$16 sps:$4 sm:$0xff]  }
 0x13c   : > { %1730 = vmatprep.mubr.bf16.mxu0 %v472_v21  ;;  %1894 = vmatprep.mubr.bf16.mxu1 %v472_v21  ;;  %v471_v21 = vpack.c.bf16 %v4268_v10, %v4268_v10 }
 0x13e   : > { %1701 = vmatpush1.bf16.msra.mxu0 %v3297_v22  ;;  %1865 = vmatpush1.bf16.msra.mxu1 %v3300_v23  ;;  %v3390_v22 = vld [vmem:[%s4178_s6 + $0x408] ss:$16 sps:$4 sm:$0xff]  }
 0x13f   : > { %1702 = vmatprep.subr.bf16.mxu0 %v3305_v24  ;;  %1866 = vmatprep.subr.bf16.mxu1 %v3308_v25  ;;  %v4344_v23 = vld [vmem:[#allocation6 + $0x8] sm:$0x3f]  ;;  %v3395_v24 = vld [vmem:[%s4178_s6 + $0x424] ss:$16 sps:$4 sm:$0xff]  }
 0x140   : > { %v3398_v25 = vld [vmem:[%s4178_s6 + $0x42c] ss:$16 sps:$4 sm:$0xff]  }
 0x142   : > { %1703 = vmatpush1.bf16.msra.mxu0 %v3303_v26  ;;  %1867 = vmatpush1.bf16.msra.mxu1 %v3306_v27  ;;  %v4350_v26 = vrot.slane %v4344_v23, %v4246_v50  ;;  %v3393_v27 = vld [vmem:[%s4178_s6 + $0x420] ss:$16 sps:$4 sm:$0xff]  }
 0x143   : > { %1704 = vmatprep.subr.bf16.mxu0 %v3311_v28  ;;  %1868 = vmatprep.subr.bf16.mxu1 %v3314_v29  ;;  %v3396_v28 = vld [vmem:[%s4178_s6 + $0x428] ss:$16 sps:$4 sm:$0xff]   ;;  %v3401_v29 = vld [vmem:[%s4178_s6 + $0x444] ss:$16 sps:$4 sm:$0xff]  }
 0x144   : > { %v461_v10 = vcombine.high %v4350_v26, %v4350_v26 }
 0x146   : > { %1705 = vmatpush1.bf16.msra.mxu0 %v3309_v30  ;;  %1869 = vmatpush1.bf16.msra.mxu1 %v3312_v31  ;;  %v3404_v30 = vld [vmem:[%s4178_s6 + $0x44c] ss:$16 sps:$4 sm:$0xff]   ;;  %v474_v31 = vpack.c.bf16 %v461_v10, %v461_v10 }
 0x147   : > { %1706 = vmatprep.subr.bf16.mxu0 %v3317_v32  ;;  %1870 = vmatprep.subr.bf16.mxu1 %v3320_v33  ;;  %v3399_v32 = vld [vmem:[%s4178_s6 + $0x440] ss:$16 sps:$4 sm:$0xff]   ;;  %v3402_v33 = vld [vmem:[%s4178_s6 + $0x448] ss:$16 sps:$4 sm:$0xff]   ;;  %v3489_v10 = vld [vmem:[%s4178_s6 + $0x60c] ss:$16 sps:$4 sm:$0xff]  }
 0x14a   : > { %1707 = vmatpush1.bf16.msra.mxu0 %v3315_v34  ;;  %1871 = vmatpush1.bf16.msra.mxu1 %v3318_v35  ;;  %v3407_v34 = vld [vmem:[%s4178_s6 + $0x464] ss:$16 sps:$4 sm:$0xff]   ;;  %v3410_v35 = vld [vmem:[%s4178_s6 + $0x46c] ss:$16 sps:$4 sm:$0xff]  }
 0x14b   : > { %1708 = vmatprep.subr.bf16.mxu0 %v3323_v36  ;;  %1872 = vmatprep.subr.bf16.mxu1 %v3326_v37  ;;  %v3405_v36 = vld [vmem:[%s4178_s6 + $0x460] ss:$16 sps:$4 sm:$0xff]   ;;  %v3408_v37 = vld [vmem:[%s4178_s6 + $0x468] ss:$16 sps:$4 sm:$0xff]  }
 0x14e   : > { %1709 = vmatpush1.bf16.msra.mxu0 %v3321_v38  ;;  %1873 = vmatpush1.bf16.msra.mxu1 %v3324_v39  ;;  %v3413_v38 = vld [vmem:[%s4178_s6 + $0x484] ss:$16 sps:$4 sm:$0xff]   ;;  %v3416_v39 = vld [vmem:[%s4178_s6 + $0x48c] ss:$16 sps:$4 sm:$0xff]  }
 0x14f   : > { %1710 = vmatprep.subr.bf16.mxu0 %v3329_v40  ;;  %1874 = vmatprep.subr.bf16.mxu1 %v3332_v41  ;;  %v3411_v40 = vld [vmem:[%s4178_s6 + $0x480] ss:$16 sps:$4 sm:$0xff]   ;;  %v3414_v41 = vld [vmem:[%s4178_s6 + $0x488] ss:$16 sps:$4 sm:$0xff]  }
 0x152   : > { %1711 = vmatpush1.bf16.msra.mxu0 %v3327_v42  ;;  %1875 = vmatpush1.bf16.msra.mxu1 %v3330_v43  ;;  %v3419_v42 = vld [vmem:[%s4178_s6 + $0x4a4] ss:$16 sps:$4 sm:$0xff]   ;;  %v3422_v43 = vld [vmem:[%s4178_s6 + $0x4ac] ss:$16 sps:$4 sm:$0xff]  }
 0x153   : > { %1712 = vmatprep.subr.bf16.mxu0 %v3335_v44  ;;  %1876 = vmatprep.subr.bf16.mxu1 %v3338_v45  ;;  %v3417_v44 = vld [vmem:[%s4178_s6 + $0x4a0] ss:$16 sps:$4 sm:$0xff]   ;;  %v3420_v45 = vld [vmem:[%s4178_s6 + $0x4a8] ss:$16 sps:$4 sm:$0xff]  }
 0x156   : > { %1713 = vmatpush1.bf16.msra.mxu0 %v3333_v46  ;;  %1877 = vmatpush1.bf16.msra.mxu1 %v3336_v47  ;;  %v3425_v46 = vld [vmem:[%s4178_s6 + $0x4c4] ss:$16 sps:$4 sm:$0xff]   ;;  %v3428_v47 = vld [vmem:[%s4178_s6 + $0x4cc] ss:$16 sps:$4 sm:$0xff]  }
 0x157   : > { %1714 = vmatprep.subr.bf16.mxu0 %v3341_v48  ;;  %1878 = vmatprep.subr.bf16.mxu1 %v3344_v49  ;;  %v3423_v48 = vld [vmem:[%s4178_s6 + $0x4c0] ss:$16 sps:$4 sm:$0xff]   ;;  %v3426_v49 = vld [vmem:[%s4178_s6 + $0x4c8] ss:$16 sps:$4 sm:$0xff]  }
 0x15a   : > { %1715 = vmatpush1.bf16.msra.mxu0 %v3339_v51  ;;  %1879 = vmatpush1.bf16.msra.mxu1 %v3342_v52  ;;  %v3431_v51 = vld [vmem:[%s4178_s6 + $0x4e4] ss:$16 sps:$4 sm:$0xff]   ;;  %v3434_v52 = vld [vmem:[%s4178_s6 + $0x4ec] ss:$16 sps:$4 sm:$0xff]  }
 0x15b   : > { %1716 = vmatprep.subr.bf16.mxu0 %v3347_v53  ;;  %1880 = vmatprep.subr.bf16.mxu1 %v3350_v54  ;;  %v3429_v53 = vld [vmem:[%s4178_s6 + $0x4e0] ss:$16 sps:$4 sm:$0xff]   ;;  %v3432_v54 = vld [vmem:[%s4178_s6 + $0x4e8] ss:$16 sps:$4 sm:$0xff]  }
 0x15e   : > { %1717 = vmatpush1.bf16.msra.mxu0 %v3345_v55  ;;  %1881 = vmatpush1.bf16.msra.mxu1 %v3348_v56  ;;  %v3437_v55 = vld [vmem:[%s4178_s6 + $0x504] ss:$16 sps:$4 sm:$0xff]   ;;  %v3440_v56 = vld [vmem:[%s4178_s6 + $0x50c] ss:$16 sps:$4 sm:$0xff]  }
 0x15f   : > { %1718 = vmatprep.subr.bf16.mxu0 %v3353_v57  ;;  %1882 = vmatprep.subr.bf16.mxu1 %v3356_v58  ;;  %v3435_v57 = vld [vmem:[%s4178_s6 + $0x500] ss:$16 sps:$4 sm:$0xff]   ;;  %v3438_v58 = vld [vmem:[%s4178_s6 + $0x508] ss:$16 sps:$4 sm:$0xff]  }
 0x162   : > { %1719 = vmatpush1.bf16.msra.mxu0 %v3351_v59  ;;  %1883 = vmatpush1.bf16.msra.mxu1 %v3354_v60  ;;  %v3443_v59 = vld [vmem:[%s4178_s6 + $0x524] ss:$16 sps:$4 sm:$0xff]   ;;  %v3446_v60 = vld [vmem:[%s4178_s6 + $0x52c] ss:$16 sps:$4 sm:$0xff]  }
 0x163   : > { %1720 = vmatprep.subr.bf16.mxu0 %v3359_v61  ;;  %1884 = vmatprep.subr.bf16.mxu1 %v3362_v62  ;;  %v3441_v61 = vld [vmem:[%s4178_s6 + $0x520] ss:$16 sps:$4 sm:$0xff]   ;;  %v3444_v62 = vld [vmem:[%s4178_s6 + $0x528] ss:$16 sps:$4 sm:$0xff]  }
 0x166   : > { %1721 = vmatpush1.bf16.msra.mxu0 %v3357_v63  ;;  %1885 = vmatpush1.bf16.msra.mxu1 %v3360_v0  ;;  %v3449_v63 = vld [vmem:[%s4178_s6 + $0x544] ss:$16 sps:$4 sm:$0xff]   ;;  %v3452_v0 = vld [vmem:[%s4178_s6 + $0x54c] ss:$16 sps:$4 sm:$0xff]  }
 0x167   : > { %1722 = vmatprep.subr.bf16.mxu0 %v3365_v1  ;;  %1886 = vmatprep.subr.bf16.mxu1 %v3368_v2  ;;  %v3447_v1 = vld [vmem:[%s4178_s6 + $0x540] ss:$16 sps:$4 sm:$0xff]   ;;  %v3450_v2 = vld [vmem:[%s4178_s6 + $0x548] ss:$16 sps:$4 sm:$0xff]  }
 0x16a   : > { %1723 = vmatpush1.bf16.msra.mxu0 %v3363_v3  ;;  %1887 = vmatpush1.bf16.msra.mxu1 %v3366_v4  ;;  %v3455_v3 = vld [vmem:[%s4178_s6 + $0x564] ss:$16 sps:$4 sm:$0xff]   ;;  %v3458_v4 = vld [vmem:[%s4178_s6 + $0x56c] ss:$16 sps:$4 sm:$0xff]  }
 0x16b   : > { %1724 = vmatprep.subr.bf16.mxu0 %v3371_v5  ;;  %1888 = vmatprep.subr.bf16.mxu1 %v3374_v6  ;;  %v3453_v5 = vld [vmem:[%s4178_s6 + $0x560] ss:$16 sps:$4 sm:$0xff]   ;;  %v3456_v6 = vld [vmem:[%s4178_s6 + $0x568] ss:$16 sps:$4 sm:$0xff]  }
 0x16e   : > { %1725 = vmatpush1.bf16.msra.mxu0 %v3369_v7  ;;  %1889 = vmatpush1.bf16.msra.mxu1 %v3372_v8  ;;  %v3461_v7 = vld [vmem:[%s4178_s6 + $0x584] ss:$16 sps:$4 sm:$0xff]   ;;  %v3464_v8 = vld [vmem:[%s4178_s6 + $0x58c] ss:$16 sps:$4 sm:$0xff]  }
 0x16f   : > { %1726 = vmatprep.subr.bf16.mxu0 %v3377_v9  ;;  %1890 = vmatprep.subr.bf16.mxu1 %v3380_v11  ;;  %v3459_v9 = vld [vmem:[%s4178_s6 + $0x580] ss:$16 sps:$4 sm:$0xff]   ;;  %v3462_v11 = vld [vmem:[%s4178_s6 + $0x588] ss:$16 sps:$4 sm:$0xff]  }
 0x172   : > { %1727 = vmatpush1.bf16.msra.mxu0 %v3375_v12  ;;  %1891 = vmatpush1.bf16.msra.mxu1 %v3378_v13  ;;  %v3467_v12 = vld [vmem:[%s4178_s6 + $0x5a4] ss:$16 sps:$4 sm:$0xff]   ;;  %v3470_v13 = vld [vmem:[%s4178_s6 + $0x5ac] ss:$16 sps:$4 sm:$0xff]  }
 0x173   : > { %1728 = vmatprep.subr.bf16.mxu0 %v3383_v14  ;;  %1892 = vmatprep.subr.bf16.mxu1 %v3386_v15  ;;  %v3465_v14 = vld [vmem:[%s4178_s6 + $0x5a0] ss:$16 sps:$4 sm:$0xff]   ;;  %v3468_v15 = vld [vmem:[%s4178_s6 + $0x5a8] ss:$16 sps:$4 sm:$0xff]  }
 0x176   : > { %1729 = vmatpush1.bf16.msra.mxu0 %v3381_v16  ;;  %1893 = vmatpush1.bf16.msra.mxu1 %v3384_v17  ;;  %v3473_v16 = vld [vmem:[%s4178_s6 + $0x5c4] ss:$16 sps:$4 sm:$0xff]   ;;  %v3476_v17 = vld [vmem:[%s4178_s6 + $0x5cc] ss:$16 sps:$4 sm:$0xff]  }
 0x177   : > { %1739 = vmatprep.subr.bf16.mxu0 %v3389_v18  ;;  %1903 = vmatprep.subr.bf16.mxu1 %v3392_v19  ;;  %v3471_v18 = vld [vmem:[%s4178_s6 + $0x5c0] ss:$16 sps:$4 sm:$0xff]   ;;  %v3474_v19 = vld [vmem:[%s4178_s6 + $0x5c8] ss:$16 sps:$4 sm:$0xff]  }
 0x179   : > { %1731 = vmatmul.mubr.bf16.vlgmr.msra.gmra.mrb[0].mxu0 %v471_v21  ;;  %1895 = vmatmul.mubr.bf16.vlgmr.msra.gmra.mrb[0].mxu1 %v471_v21  ;;  %v3482_v21 = vld [vmem:[%s4178_s6 + $0x5ec] ss:$16 sps:$4 sm:$0xff]  }
 0x17a   : > { %1740 = vmatpush1.bf16.msra.mxu0 %v3387_v20  ;;  %1904 = vmatpush1.bf16.msra.mxu1 %v3390_v22  ;;  %v3479_v20 = vld [vmem:[%s4178_s6 + $0x5e4] ss:$16 sps:$4 sm:$0xff]   ;;  %v3477_v22 = vld [vmem:[%s4178_s6 + $0x5e0] ss:$16 sps:$4 sm:$0xff]  }
 0x17b   : > { %1741 = vmatprep.subr.bf16.mxu0 %v3395_v24  ;;  %1905 = vmatprep.subr.bf16.mxu1 %v3398_v25  ;;  %v3480_v24 = vld [vmem:[%s4178_s6 + $0x5e8] ss:$16 sps:$4 sm:$0xff]   ;;  %v3486_v25 = vld [vmem:[%s4178_s6 + $0x604] ss:$16 sps:$4 sm:$0xff]  }
 0x17c   : > { %1771 = vmatprep.mubr.bf16.mxu0 %v474_v31  ;;  %1935 = vmatprep.mubr.bf16.mxu1 %v474_v31  ;;  %v3825_v31 = vmov 0  }
 0x17e   : > { %1742 = vmatpush1.bf16.msra.mxu0 %v3393_v27  ;;  %1906 = vmatpush1.bf16.msra.mxu1 %v3396_v28  ;;  %v473_v27 = vpack.c.bf16 %v4350_v26, %v4350_v26  ;;  %v3484_v28 = vld [vmem:[%s4178_s6 + $0x600] ss:$16 sps:$4 sm:$0xff]  }
 0x17f   : > { %1743 = vmatprep.subr.bf16.mxu0 %v3401_v29  ;;  %1907 = vmatprep.subr.bf16.mxu1 %v3404_v30  ;;  %v3487_v29 = vld [vmem:[%s4178_s6 + $0x608] ss:$16 sps:$4 sm:$0xff]   ;;  %v446_v30 = vcombine.high %v4344_v23, %v4344_v23 }
 0x182   : > { %1744 = vmatpush1.bf16.msra.mxu0 %v3399_v32  ;;  %1908 = vmatpush1.bf16.msra.mxu1 %v3402_v33  ;;  %v460_v32 = vrot.slane %v446_v30, %v4246_v50 }
 0x183   : > { %1745 = vmatprep.subr.bf16.mxu0 %v3407_v34  ;;  %1909 = vmatprep.subr.bf16.mxu1 %v3410_v35 }
 0x184   : > { %v475_v33 = vpack.c.bf16 %v460_v32, %v460_v32 }
 0x186   : > { %1746 = vmatpush1.bf16.msra.mxu0 %v3405_v36  ;;  %1910 = vmatpush1.bf16.msra.mxu1 %v3408_v37 }
 0x187   : > { %1747 = vmatprep.subr.bf16.mxu0 %v3413_v38  ;;  %1911 = vmatprep.subr.bf16.mxu1 %v3416_v39 }
 0x18a   : > { %1748 = vmatpush1.bf16.msra.mxu0 %v3411_v40  ;;  %1912 = vmatpush1.bf16.msra.mxu1 %v3414_v41 }
 0x18b   : > { %1749 = vmatprep.subr.bf16.mxu0 %v3419_v42  ;;  %1913 = vmatprep.subr.bf16.mxu1 %v3422_v43 }
 0x18e   : > { %1750 = vmatpush1.bf16.msra.mxu0 %v3417_v44  ;;  %1914 = vmatpush1.bf16.msra.mxu1 %v3420_v45  ;;  %v476_v44 = vld [vmem:[#allocation2] sm:$0xff] }
 0x18f   : > { %1751 = vmatprep.subr.bf16.mxu0 %v3425_v46  ;;  %1915 = vmatprep.subr.bf16.mxu1 %v3428_v47 }
 0x192   : > { %1752 = vmatpush1.bf16.msra.mxu0 %v3423_v48  ;;  %1916 = vmatpush1.bf16.msra.mxu1 %v3426_v49 }
 0x193   : > { %1753 = vmatprep.subr.bf16.mxu0 %v3431_v51  ;;  %1917 = vmatprep.subr.bf16.mxu1 %v3434_v52 }
 0x196   : > { %1754 = vmatpush1.bf16.msra.mxu0 %v3429_v53  ;;  %1918 = vmatpush1.bf16.msra.mxu1 %v3432_v54 }
 0x197   : > { %1755 = vmatprep.subr.bf16.mxu0 %v3437_v55  ;;  %1919 = vmatprep.subr.bf16.mxu1 %v3440_v56 }
 0x19a   : > { %1756 = vmatpush1.bf16.msra.mxu0 %v3435_v57  ;;  %1920 = vmatpush1.bf16.msra.mxu1 %v3438_v58 }
 0x19b   : > { %1757 = vmatprep.subr.bf16.mxu0 %v3443_v59  ;;  %1921 = vmatprep.subr.bf16.mxu1 %v3446_v60 }
 0x19e   : > { %1758 = vmatpush1.bf16.msra.mxu0 %v3441_v61  ;;  %1922 = vmatpush1.bf16.msra.mxu1 %v3444_v62 }
 0x19f   : > { %1759 = vmatprep.subr.bf16.mxu0 %v3449_v63  ;;  %1923 = vmatprep.subr.bf16.mxu1 %v3452_v0 }
 0x1a2   : > { %1760 = vmatpush1.bf16.msra.mxu0 %v3447_v1  ;;  %1924 = vmatpush1.bf16.msra.mxu1 %v3450_v2 }
 0x1a3   : > { %1761 = vmatprep.subr.bf16.mxu0 %v3455_v3  ;;  %1925 = vmatprep.subr.bf16.mxu1 %v3458_v4 }
 0x1a6   : > { %1762 = vmatpush1.bf16.msra.mxu0 %v3453_v5  ;;  %1926 = vmatpush1.bf16.msra.mxu1 %v3456_v6 }
 0x1a7   : > { %1763 = vmatprep.subr.bf16.mxu0 %v3461_v7  ;;  %1927 = vmatprep.subr.bf16.mxu1 %v3464_v8 }
 0x1aa   : > { %1764 = vmatpush1.bf16.msra.mxu0 %v3459_v9  ;;  %1928 = vmatpush1.bf16.msra.mxu1 %v3462_v11 }
 0x1ab   : > { %1765 = vmatprep.subr.bf16.mxu0 %v3467_v12  ;;  %1929 = vmatprep.subr.bf16.mxu1 %v3470_v13 }
 0x1ae   : > { %1766 = vmatpush1.bf16.msra.mxu0 %v3465_v14  ;;  %1930 = vmatpush1.bf16.msra.mxu1 %v3468_v15 }
 0x1af   : > { %1767 = vmatprep.subr.bf16.mxu0 %v3473_v16  ;;  %1931 = vmatprep.subr.bf16.mxu1 %v3476_v17 }
 0x1b2   : > { %1768 = vmatpush1.bf16.msra.mxu0 %v3471_v18  ;;  %1932 = vmatpush1.bf16.msra.mxu1 %v3474_v19 }
 0x1b3   : > { %1769 = vmatprep.subr.bf16.mxu0 %v3479_v20  ;;  %1933 = vmatprep.subr.bf16.mxu1 %v3482_v21 }
 0x1b6   : > { %1770 = vmatpush1.bf16.msra.mxu0 %v3477_v22  ;;  %1934 = vmatpush1.bf16.msra.mxu1 %v3480_v24 }
 0x1b7   : > { %1780 = vmatprep.subr.bf16.mxu0 %v3486_v25  ;;  %1944 = vmatprep.subr.bf16.mxu1 %v3489_v10 }
 0x1b9   : > { %1772 = vmatmul.mubr.bf16.vlgmr.msra.gmra.mrb[0].mxu0 %v473_v27  ;;  %1936 = vmatmul.mubr.bf16.vlgmr.msra.gmra.mrb[0].mxu1 %v473_v27 }
 0x1ba   : > { %1781 = vmatpush1.bf16.msra.mxu0 %v3484_v28  ;;  %1945 = vmatpush1.bf16.msra.mxu1 %v3487_v29 }
 0x1bb   : > { %1812 = vmatprep.mubr.bf16.mxu0 %v3825_v31  ;;  %1976 = vmatprep.mubr.bf16.mxu1 %v3825_v31 }
 0x1c5   : > { %2862 = vmatmul.mubr.msk.bf16.vlgmr.msra.gmra.mrb[0].mxu0 %vm1653_vm0, %v475_v33  ;;  %2863 = vmatmul.mubr.msk.bf16.vlgmr.msra.gmra.mrb[0].mxu1 %vm1653_vm0, %v475_v33 }
 0x298   : > { %v1814_v26 = vpop.f32.mrb[0].mxu0  ;;  %v1978_v34 = vpop.f32.mrb[0].mxu1 }
 0x299   : > { %v1816_v35 = vpop.f32.mrb[1].mxu0  ;;  %v1980_v36 = vpop.f32.mrb[1].mxu1 }
 0x29a   : > { %v1989_v37 = vcombine.low %v1814_v26, %v1816_v35  ;;  %v1990_v38 = vcombine.low %v1978_v34, %v1980_v36  ;;  %v1818_v23 = vpop.f32.mrb[2].mxu0  ;;  %v1982_v39 = vpop.f32.mrb[2].mxu1 }
 0x29b   : > { %v1819_v40 = vpop.f32.mrb[3].mxu0  ;;  %v1983_v41 = vpop.f32.mrb[3].mxu1 }
 0x29c   : > { %v1997_v42 = vrot.slane %v1989_v37, %v4246_v50  ;;  %v2004_v43 = vrot.slane %v1990_v38, %v4246_v50 }
 0x29e   : > { %v2005_v45 = vcombine.low %v1997_v42, %v2004_v43 }
 0x2a0   : > { %v2007_v46 = vadd.f32 %v2005_v45, %v476_v44 }
 0x2a2   : > { %2008 = vst [vmem:[#allocation2] sm:$0xff] %v2007_v46 }
 0x2a3 PF: > { %p2864_p1 = scmp.lt.s32.totalorder %s3922_s21, 2 }
 0x2a4   : > { %v3490_v47 = vld [vmem:[%s4185_s12 + $0x40] sm:$0xff] (!%p2864_p1)   ;;  %v3494_v51 = vld [vmem:[%s4185_s12 + $0x48] sm:$0xff] (!%p2864_p1)   ;;  %v3498_v55 = vld [vmem:[%s4185_s12 + $0x50] sm:$0xff] (!%p2864_p1)   ;;  %v2016_v2 = vlaneseq (!%p2864_p1)  ;;  %v3826_v28 = vmov (!%p2864_p1), 1983009808  }
 0x2a5   : > { %2012 = sbr.rel (%p2864_p1) target bundleno = 931 (0x3a3), region = 84  ;;  %v3491_v48 = vld [vmem:[%s4185_s12 + $0xc0] sm:$0xff] (!%p2864_p1)   ;;  %2911 = vmatprep.subr.bf16.mxu0 (!%p2864_p1), %v3490_v47  ;;  %v3495_v52 = vld [vmem:[%s4185_s12 + $0xc8] sm:$0xff] (!%p2864_p1)   ;;  %v3499_v56 = vld [vmem:[%s4185_s12 + $0xd0] sm:$0xff] (!%p2864_p1)   ;;  %v2035_v29 = vunpack.c.l.s4 (!%p2864_p1), %v3826_v28 }
 0x2a6   : > { %v3492_v50 = vld [vmem:[%s4185_s12] sm:$0xff] (!%p2864_p1)   ;;  %2933 = vmatprep.subr.bf16.mxu1 (!%p2864_p1), %v3491_v48  ;;  %v3496_v53 = vld [vmem:[%s4185_s12 + $0x8] sm:$0xff] (!%p2864_p1)   ;;  %v3500_v57 = vld [vmem:[%s4185_s12 + $0x10] sm:$0xff] (!%p2864_p1)   ;;  %v2017_v7 = vshrl.u32 (!%p2864_p1), %v2016_v2, 7 }
 0x2a7   : > { %v3493_v49 = vld [vmem:[%s4185_s12 + $0x80] sm:$0xff] (!%p2864_p1)   ;;  %2912 = vmatpush3.bf16.msra.mxu0 (!%p2864_p1), %v3492_v50  ;;  %v3497_v54 = vld [vmem:[%s4185_s12 + $0x88] sm:$0xff] (!%p2864_p1)   ;;  %v3501_v58 = vld [vmem:[%s4185_s12 + $0x90] sm:$0xff] (!%p2864_p1)   ;;  %v2036_v32 = vunpack.c.0.s8 (!%p2864_p1), %v2035_v29 }
 0x2a8   : > { %2934 = vmatpush3.bf16.msra.mxu1 (!%p2864_p1), %v3493_v49  ;;  %2913 = vmatprep.subr.bf16.mxu0 (!%p2864_p1), %v3494_v51  ;;  %v3502_v59 = vld [vmem:[%s4185_s12 + $0x58] sm:$0xff] (!%p2864_p1)   ;;  %v3506_v63 = vld [vmem:[%s4185_s12 + $0x60] sm:$0xff] (!%p2864_p1)   ;;  %v3510_v4 = vld [vmem:[%s4185_s12 + $0x68] sm:$0xff] (!%p2864_p1)   ;;  %v2018_v13 = vsub.s32 (!%p2864_p1), 0, %v2017_v7  ;;  %v2022_v15 = vsub.s32 (!%p2864_p1), 1, %v2017_v7  ;;  %v2026_v17 = vsub.s32 (!%p2864_p1), 2, %v2017_v7 }
 0x2a9   : > { %2935 = vmatprep.subr.bf16.mxu1 (!%p2864_p1), %v3495_v52  ;;  %v3503_v60 = vld [vmem:[%s4185_s12 + $0xd8] sm:$0xff] (!%p2864_p1)   ;;  %v3507_v0 = vld [vmem:[%s4185_s12 + $0xe0] sm:$0xff] (!%p2864_p1)   ;;  %v3511_v5 = vld [vmem:[%s4185_s12 + $0xe8] sm:$0xff] (!%p2864_p1)   ;;  %v2030_v19 = vsub.s32 (!%p2864_p1), 3, %v2017_v7  ;;  %v2039_v33 = vsub.s32 (!%p2864_p1), %v2036_v32, %v2017_v7 }
 0x2aa   : > { %v3504_v61 = vld [vmem:[%s4185_s12 + $0x18] sm:$0xff] (!%p2864_p1)   ;;  %v3508_v1 = vld [vmem:[%s4185_s12 + $0x20] sm:$0xff] (!%p2864_p1)   ;;  %v3512_v6 = vld [vmem:[%s4185_s12 + $0x28] sm:$0xff] (!%p2864_p1)  }
 0x2ab   : > { %2914 = vmatpush3.bf16.msra.mxu0 (!%p2864_p1), %v3496_v53  ;;  %v3505_v62 = vld [vmem:[%s4185_s12 + $0x98] sm:$0xff] (!%p2864_p1)   ;;  %v3509_v3 = vld [vmem:[%s4185_s12 + $0xa0] sm:$0xff] (!%p2864_p1)   ;;  %v3513_v8 = vld [vmem:[%s4185_s12 + $0xa8] sm:$0xff] (!%p2864_p1)  }
 0x2ac   : > { %2936 = vmatpush3.bf16.msra.mxu1 %v3497_v54  ;;  %2915 = vmatprep.subr.bf16.mxu0 %v3498_v55  ;;  %v3514_v9 = vld [vmem:[%s4185_s12 + $0x70] sm:$0xff]   ;;  %v3518_v16 = vld [vmem:[%s4185_s12 + $0x78] sm:$0xff]   ;;  %v2014_v22 = vld [vmem:[#allocation12] sm:$0xf] }
 0x2ad   : > { %2937 = vmatprep.subr.bf16.mxu1 %v3499_v56  ;;  %v3515_v11 = vld [vmem:[%s4185_s12 + $0xf0] sm:$0xff]   ;;  %v3519_v18 = vld [vmem:[%s4185_s12 + $0xf8] sm:$0xff]   ;;  %v2019_v24 = vrot.slane %v2014_v22, %v2018_v13  ;;  %v2023_v25 = vrot.slane %v2014_v22, %v2022_v15  ;;  %v2027_v10 = vrot.slane %v2014_v22, %v2026_v17  ;;  %v2031_v27 = vrot.slane %v2014_v22, %v2030_v19  ;;  %v2013_v35 = vld [vmem:[#allocation2] sm:$0xff] }
 0x2ae   : > { %v3516_v12 = vld [vmem:[%s4185_s12 + $0x30] sm:$0xff]   ;;  %v3520_v20 = vld [vmem:[%s4185_s12 + $0x38] sm:$0xff]  }
 0x2af   : > { %2916 = vmatpush3.bf16.msra.mxu0 %v3500_v57  ;;  %v3517_v14 = vld [vmem:[%s4185_s12 + $0xb0] sm:$0xff]   ;;  %v3521_v21 = vld [vmem:[%s4185_s12 + $0xb8] sm:$0xff]   ;;  %v2032_v30 = vcombine.low %v2019_v24, %v2023_v25  ;;  %v2033_v31 = vcombine.low %v2027_v10, %v2031_v27 }
 0x2b0   : > { %2938 = vmatpush3.bf16.msra.mxu1 %v3501_v58  ;;  %2917 = vmatprep.subr.bf16.mxu0 %v3502_v59  ;;  %v2052_v56 = vld [vmem:[#allocation3] sm:$0x3] }
 0x2b1   : > { %2939 = vmatprep.subr.bf16.mxu1 %v3503_v60  ;;  %v2040_v26 = vrot.slane %v2032_v30, %v2039_v33  ;;  %v2047_v34 = vrot.slane %v2033_v31, %v2039_v33 }
 0x2b3   : > { %2918 = vmatpush3.bf16.msra.mxu0 %v3504_v61  ;;  %v2048_v36 = vcombine.low %v2040_v26, %v2047_v34 }
 0x2b4   : > { %2940 = vmatpush3.bf16.msra.mxu1 %v3505_v62  ;;  %2919 = vmatprep.subr.bf16.mxu0 %v3506_v63 }
 0x2b5   : > { %2941 = vmatprep.subr.bf16.mxu1 %v3507_v0  ;;  %v2050_v37 = vadd.f32 %v2048_v36, %v2013_v35 }
 0x2b7   : > { %2920 = vmatpush3.bf16.msra.mxu0 %v3508_v1  ;;  %v2051_v38 = vmax.f32 %v2050_v37, 0.0 }
 0x2b8   : > { %2942 = vmatpush3.bf16.msra.mxu1 %v3509_v3  ;;  %2921 = vmatprep.subr.bf16.mxu0 %v3510_v4 }
 0x2b9   : > { %2943 = vmatprep.subr.bf16.mxu1 %v3511_v5  ;;  %v2061_v23 = vrot.slane %v2051_v38, %v2039_v33  ;;  %v2054_v39 = vcombine.high %v2051_v38, %v2051_v38 }
 0x2bb   : > { %2922 = vmatpush3.bf16.msra.mxu0 %v3512_v6  ;;  %v2069_v40 = vcombine.high %v2061_v23, %v2061_v23  ;;  %v2068_v41 = vrot.slane %v2054_v39, %v2039_v33  ;;  %v2075_v42 = vpack.c.bf16 %v2061_v23, %v2061_v23 }
 0x2bc   : > { %2944 = vmatpush3.bf16.msra.mxu1 %v3513_v8  ;;  %2923 = vmatprep.subr.bf16.mxu0 %v3514_v9 }
 0x2bd   : > { %2945 = vmatprep.subr.bf16.mxu1 %v3515_v11  ;;  %v2076_v43 = vpack.c.bf16 %v2069_v40, %v2069_v40  ;;  %v2070_v44 = vcombine.high %v2068_v41, %v2068_v41  ;;  %v2077_v45 = vpack.c.bf16 %v2068_v41, %v2068_v41 }
 0x2bf   : > { %2924 = vmatpush3.bf16.msra.mxu0 %v3516_v12  ;;  %2367 = vmatprep.mubr.bf16.mxu0 %v2076_v43  ;;  %v2078_v46 = vpack.c.bf16 %v2070_v44, %v2070_v44 }
 0x2c0   : > { %2946 = vmatpush3.bf16.msra.mxu1 %v3517_v14  ;;  %2925 = vmatprep.subr.bf16.mxu0 %v3518_v16 }
 0x2c1   : > { %2947 = vmatprep.subr.bf16.mxu1 %v3519_v18  ;;  %2407 = vmatprep.mubr.bf16.mxu1 %v2078_v46 }
 0x2c3   : > { %2926 = vmatpush3.bf16.msra.mxu0 %v3520_v20 }
 0x2c4   : > { %2948 = vmatpush3.bf16.msra.mxu1 %v3521_v21 }
 0x2c6   : > { %2368 = vmatmul.mubr.bf16.vlgmr.msra.gmra.mrb[0].mxu0 %v2075_v42 }
 0x2c7   : > { %2408 = vmatmul.mubr.bf16.vlgmr.msra.gmra.mrb[0].mxu1 %v2077_v45 }
 0x399   : > { %v2927_v47 = vpop.f32.mrb[0].mxu0 }
 0x39a   : > { %v2928_v48 = vpop.f32.mrb[1].mxu0  ;;  %v2949_v50 = vpop.f32.mrb[0].mxu1 }
 0x39b   : > { %v2929_v49 = vadd.f32 %v2928_v48, %v2927_v47  ;;  %v2930_v51 = vpop.f32.mrb[2].mxu0  ;;  %v2950_v52 = vpop.f32.mrb[1].mxu1 }
 0x39c   : > { %v2931_v53 = vpop.f32.mrb[3].mxu0  ;;  %v2951_v54 = vadd.f32 %v2950_v52, %v2949_v50  ;;  %v2952_v55 = vpop.f32.mrb[2].mxu1 }
 0x39d   : > { %v2953_v57 = vpop.f32.mrb[3].mxu1 }
 0x39e   : > { %v2410_v58 = vadd.f32 %v2951_v54, %v2929_v49 }
 0x3a0   : > { %v2415_v59 = vadd.f32 %v2410_v58, %v2052_v56 }
 0x3a2   : > { %2416 = vst [vmem:[#allocation3] sm:$0x3] %v2415_v59 }
 0x3a3 PF: > { %p2897_p10 = scmp.ne.s32.totalorder %s3922_s21, 2 }
 0x3a4   : > { %s4606_s22 = sld [smem:[#allocation33_spill]] (!%p2897_p10)  ;;  %v3827_v63 = vmov (!%p2897_p10), 0.0|0.0   ;;  %vm3828_vm1 = vmmov (!%p2897_p10), 0   ;;  %v3829_v2 = vmov (!%p2897_p10), 0.0   ;;  %v2898_v21 = vld [vmem:[#allocation14] ss:$0 sm:$0xff] (!%p2897_p10) }
 0x3a5   : > { %2420 = sbr.rel (%p2897_p10) target bundleno = 1187 (0x4a3), region = 88  ;;  %3007 = vmatprep.subr.bf16.mxu0 (!%p2897_p10), %v3827_v63  ;;  %3004 = vmatprep.mubr.msk.f32.mxu0 (!%p2897_p10), %vm3828_vm1, %v3829_v2  ;;  %v2899_v28 = vld [vmem:[#allocation15] ss:$0 sm:$0xff] (!%p2897_p10)  ;;  %vm2524_vm2 = vcmask (!%p2897_p10), 74752  }
 0x3a9   : > { %v2421_v20 = vld [vmem:[#allocation3] sm:$0x3] (!%p2897_p10) }
 0x3aa   : > { %v2431_v60 = vld [vmem:[%s4606_s22] sm:$0xff] (!%p2897_p10)  ;;  %v2432_v61 = vld [vmem:[%s4606_s22 + $0x8] sm:$0xff] (!%p2897_p10)  ;;  %v2433_v62 = vld [vmem:[%s4606_s22 + $0x10] sm:$0xff] (!%p2897_p10)  ;;  %v2429_v25 = vadd.f32 (!%p2897_p10), %v2898_v21, %v2421_v20 }
 0x3ab   : > { %v3008_v0 = vpack.c.bf16 (!%p2897_p10), %v2432_v61, %v2431_v60  ;;  %v2434_v1 = vld [vmem:[%s4606_s22 + $0x18] sm:$0xff] (!%p2897_p10)  ;;  %v2435_v4 = vld [vmem:[%s4606_s22 + $0x20] sm:$0xff] (!%p2897_p10)  ;;  %v2436_v5 = vld [vmem:[%s4606_s22 + $0x28] sm:$0xff] (!%p2897_p10) }
 0x3ac   : > { %v3011_v3 = vpack.c.bf16 %v2434_v1, %v2433_v62  ;;  %v3014_v6 = vpack.c.bf16 %v2436_v5, %v2435_v4  ;;  %v2437_v7 = vld [vmem:[%s4606_s22 + $0x30] sm:$0xff]  ;;  %v2438_v8 = vld [vmem:[%s4606_s22 + $0x38] sm:$0xff]  ;;  %v2439_v11 = vld [vmem:[%s4606_s22 + $0x40] sm:$0xff]  ;;  %v2430_v27 = vmax.f32 %v2429_v25, 0.0 }
 0x3ad   : > { %3009 = vmatpush3.bf16.msra.mxu0 %v3008_v0  ;;  %v3017_v9 = vpack.c.bf16 %v2438_v8, %v2437_v7  ;;  %v2440_v12 = vld [vmem:[%s4606_s22 + $0x48] sm:$0xff]  ;;  %v2441_v14 = vld [vmem:[%s4606_s22 + $0x50] sm:$0xff]  ;;  %v2442_v15 = vld [vmem:[%s4606_s22 + $0x58] sm:$0xff] }
 0x3ae   : > { %3010 = vmatprep.subr.bf16.mxu0 %v3827_v63  ;;  %v3020_v13 = vpack.c.bf16 %v2440_v12, %v2439_v11  ;;  %v3023_v16 = vpack.c.bf16 %v2442_v15, %v2441_v14  ;;  %v2443_v17 = vld [vmem:[%s4606_s22 + $0x60] sm:$0xff]  ;;  %v2444_v18 = vld [vmem:[%s4606_s22 + $0x68] sm:$0xff]  ;;  %v2445_v22 = vld [vmem:[%s4606_s22 + $0x70] sm:$0xff] }
 0x3af   : > { %v3026_v19 = vpack.c.bf16 %v2444_v18, %v2443_v17  ;;  %v2446_v24 = vld [vmem:[%s4606_s22 + $0x78] sm:$0xff] }
 0x3b0   : > { %v3029_v10 = vpack.c.bf16 %v2446_v24, %v2445_v22 }
 0x3b1   : > { %3012 = vmatpush3.bf16.msra.mxu0 %v3011_v3 }
 0x3b2   : > { %3013 = vmatprep.subr.bf16.mxu0 %v3827_v63 }
 0x3b5   : > { %3015 = vmatpush3.bf16.msra.mxu0 %v3014_v6 }
 0x3b6   : > { %3016 = vmatprep.subr.bf16.mxu0 %v3827_v63 }
 0x3b9   : > { %3018 = vmatpush3.bf16.msra.mxu0 %v3017_v9 }
 0x3ba   : > { %3019 = vmatprep.subr.bf16.mxu0 %v3827_v63 }
 0x3bd   : > { %3021 = vmatpush3.bf16.msra.mxu0 %v3020_v13 }
 0x3be   : > { %3022 = vmatprep.subr.bf16.mxu0 %v3827_v63 }
 0x3c1   : > { %3024 = vmatpush3.bf16.msra.mxu0 %v3023_v16 }
 0x3c2   : > { %3025 = vmatprep.subr.bf16.mxu0 %v3827_v63 }
 0x3c5   : > { %3027 = vmatpush3.bf16.msra.mxu0 %v3026_v19 }
 0x3c6   : > { %3028 = vmatprep.subr.bf16.mxu0 %v3827_v63 }
 0x3c9   : > { %3030 = vmatpush3.bf16.msra.mxu0 %v3029_v10 }
 0x3cc   : > { %3005 = vmatmul.mubr.f32.vlgmr.msra.gmra.mrb[0].mxu0 %v2430_v27 }
 0x49f   : > { %v2520_v29 = vpop.f32.mrb[0].mxu0 }
 0x4a0   : > { %v2521_v30 = vadd.f32 %v2899_v28, %v2520_v29  ;;  %v3006_v31 = vpop.f32.mrb[1].mxu0 }
 0x4a2   : > { %2525 = vst.msk [vmem:[#allocation17] sm:$0x3] %vm2524_vm2, %v2521_v30 }
 0x4a3 PF: > { %p3119_p4 = scmp.eq.s32.totalorder %s3922_s21, 2  ;;  %s3830_s26 = smov [#allocation17]  }
 0x4a4   : > { %s2533_s6 = sshll.u32 %s3830_s26, 4  ;;  %s2534_s6 = int_to_ptr.vmem [resolvable:$true] %s2533_s6 }
 0x4a5   : > { %s3704_s23 = scalar_lea.vmem %s2534_s6, 32  ;;  %p3711_p11 = scmp.lt.s32.totalorder %s2534_s6, %s2534_s6 }
 0x4a6   : > { %p3705_p5 = scmp.ne.s32.totalorder %s2534_s6, %s3704_s23  ;;  %p3712_p0 = scmp.lt.s32.totalorder %s3704_s23, %s3704_s23 }
 0x4a8   : > { %p3706_p6 = pnand %p3705_p5, %p3119_p4  ;;  %p3713_p9 = por %p3712_p0, %p3711_p11 }
 0x4aa   : > { %p3707_p13 = pneg %p3706_p6 }
 0x4ac   : > { %p3714_p3 = pnand %p3713_p9, %p3707_p13 }
 0x4ae   : > { %3717 = shalt.err (!%p3714_p3)
}
 0x4af   : > { %s4607_s12 = sld [smem:[#allocation34_spill]] }
 0x4b5   : > { %s3718_s10 = scalar_lea.hbm %s4607_s12, 32 }
 0x4b6   : > { %p3719_p8 = scmp.ne.s32.totalorder %s4607_s12, %s3718_s10  ;;  %p3724_p2 = scmp.lt.u32.totalorder %s3718_s10, %s4607_s12 }
 0x4b8   : > { %p3720_p12 = pnand %p3719_p8, %p3119_p4 }
 0x4ba   : > { %p3721_p7 = pneg %p3720_p12 }
 0x4bc   : > { %p3726_p1 = pnand %p3724_p2, %p3721_p7 }
 0x4be   : > { %3729 = shalt.err (!%p3726_p1)
}
 0x4bf   : > { %3083 = dma.vmem_to_hbm [thread:$0]  (%p3119_p4), %s2534_s6, 32, %s4607_s12, [#allocation8]  }
 0x4c0   : > { %3781 = dma.done.wait (%p3119_p4), [#allocation8], 32  }
 0x4c1   : > { %3783 = vsyncadd (%p3119_p4), [#allocation8], 4294967264 }
 0x4c2 PF: > { %s4608_s13 = sld [smem:[#allocation29_spill]]  ;;  %s4609_s0 = sld [smem:[#allocation31_spill]] }
 0x4c3   : > { %p26_p10 = scmp.ge.s32.totalorder %s3948_s27, 5   ;;  %s4610_s15 = smov %s3790_s16 }
 0x4c4   : > { %s4611_s16 = smov %s3794_s17  ;;  %s4612_s17 = smov %s4127_s11 }
 0x4c5   : > { %s4613_s18 = smov %s3802_s19  ;;  %s4615_s20 = smov %s3948_s27 }
 0x4c6   :  { %28 = sbr.rel (!%p26_p10) target bundleno = 22 (0x16), region = 129 }
 0x4c8   : > { %s4614_s19 = smov %s4608_s13 }
 0x4cd   :  { %2546 = vsyncpa [#allocation7], 1 }
 0x4ce   :  { %2548 = vsyncpa [#allocation7 + $0x1], 1 }
 0x4cf   :  { %2549 = vsyncpa [#allocation10], 1 }
 0x4d0   :  { %2551 = vsyncpa [#allocation10 + $0x1], 1 }
 0x4d1   :  { %2552 = vsyncpa [#allocation13], 1 }
 0x4d2   :  { %2553 = vsyncpa [#allocation16], 1 }
 0x4d3   :  { %2554 = vsyncpa [#allocation8], 1 }
 0x4d4   :  { %2556 = vsyncpa [#allocation8 + $0x1], 1 }

</bundles_post_ra>
